<compile_context>
chip_gen: v7x
topology: tpu7x:2x2x1
jax: 0.10.0
libtpu: 0.0.40
codegen_flags: <defaults>
</compile_context>

<pallas_src>
import math
import jax
import jax.numpy as jnp
from jax import lax
from jax.experimental import pallas as pl
from jax.experimental.pallas import tpu as pltpu

# ----------------------------- config -----------------------------
B, C, T = 2, 4, 8          # batch, candidates per query, seq len
H, F = 32, 64              # hidden size, FFN size
VOCAB, TYPE_VOCAB = 50, 2
N = B * C                  # flattened number of sequences
NT = N * T                 # total rows fed through the encoder matmuls
INIT_RANGE = 0.02          # encoder.config.initializer_range
LANES = 128

# ---- packed weight-slab layout (one lane-dense f32 (SLAB_ROWS,128) DMA) ----
R_WQKV = 0                 # rows [0,H)      lanes [0:3H) = Wq|Wk|Wv   (lane 0)
R_WO = H                   # rows [H,2H)     lanes [0:H)  = Wo         (lane 0)
R_WFF1 = 2 * H             # rows [2H,3H)    lanes [0:F)  = FFN1 W     (lane 0)
R_WFF2 = 3 * H             # rows [3H,3H+F)  lanes [0:H)  = FFN2 W     (lane 0)
R_WPOOL = 3 * H + F        # rows [..,..+H)  lanes [0:H)  = pooler W   (lane 0)
R_CONST = 4 * H + F        # const rows start (= 192)
CONST_ROWS = 16            # allocated const rows (13 used)
SLAB_ROWS = R_CONST + CONST_ROWS

# const-row indices (relative to R_CONST)
_C_BQKV = 0                # b_q | b_k | b_v              (lanes 0:3H)
_C_BO = 1                  # attention output bias        (lanes 0:H)
_C_BFF1 = 2                # FFN1 bias                    (lanes 0:F)
_C_BFF2 = 3                # FFN2 bias                    (lanes 0:H)
_C_LN = 4                  # rows 4..9: emb_g, emb_b, ln1_g, ln1_b, ln2_g, ln2_b
_C_BPOOL = 10              # pooler bias                  (lanes 0:H)
_C_WSCORE = 11             # score_layer weight           (lanes 0:H)
_C_BSCORE = 12             # score_layer bias             (lane 0)

# packed output row (1, 128) lane layout
_O_SCORES = 0              # lanes [0:N)       masked scores (flattened B*C)
_O_MAX = N                 # lanes [N:N+B)     per-query max score
_O_PRED = N + B            # lanes [N+B:N+2B)  per-query argmax (stored as f32)
_O_LOSS = N + 2 * B        # lane  N+2B        mean CE loss


# ------------------------ fused Pallas kernel ----------------------
def _layer_norm(v, g, b, eps=1e-12):
    # E[x] and E[x*x] computed independently -> the two reductions overlap.
    mu = jnp.mean(v, axis=-1, keepdims=True)
    ms = jnp.mean(v * v, axis=-1, keepdims=True)
    var = jnp.maximum(ms - mu * mu, 0.0)
    return (v - mu) * lax.rsqrt(var + eps) * g + b


def full_ranker_kernel(x_ref, w_ref, lens_ref, stats_ref):
    """Whole FullRanker forward in one (gridless) kernel invocation.

    x_ref     : (N*T, H)         embeddings (word+type+pos already summed)
    w_ref     : (SLAB_ROWS, 128) every weight / bias / LN / score constant
    lens_ref  : (1, N)           input_lens flattened, int32
    stats_ref : (1, 128)         packed output row, see _O_* layout
    """
    cst = w_ref[R_CONST:R_CONST + CONST_ROWS, :]               # (16, 128)
    ln_eg = cst[_C_LN + 0:_C_LN + 1, 0:H]
    ln_eb = cst[_C_LN + 1:_C_LN + 2, 0:H]
    ln1_g = cst[_C_LN + 2:_C_LN + 3, 0:H]
    ln1_b = cst[_C_LN + 3:_C_LN + 4, 0:H]
    ln2_g = cst[_C_LN + 4:_C_LN + 5, 0:H]
    ln2_b = cst[_C_LN + 5:_C_LN + 6, 0:H]

    # ---- embedding layernorm over all N*T rows at once ----
    x = _layer_norm(x_ref[...], ln_eg, ln_eb)                  # (NT, H)

    # ---- fused Q|K|V projection: one lane-dense (NT,H)x(H,128) MXU pass.
    #      RHS lanes [3H:128) are zero padding (result discarded). ----
    qkv = (jnp.dot(x, w_ref[R_WQKV:R_WQKV + H, :],
                   preferred_element_type=jnp.float32)
           + cst[_C_BQKV:_C_BQKV + 1, :])                      # (NT, 128)
    q = qkv[:, 0:H]
    k = qkv[:, H:2 * H]
    v = qkv[:, 2 * H:3 * H]                                    # (NT, H) each

    # ---- single-head self-attention for all N sequences as ONE block-diagonal
    #      matmul pair; off-block entries masked to -inf BEFORE the softmax.
    # TODO(synk): no key-padding mask from input_lens (an HF encoder would use
    # attention_mask); the synthetic encoder attends over all T positions.
    # TODO(synk): scale is 1/sqrt(H); real BERT uses 1/sqrt(head_dim).
    s = lax.dot_general(q, k, (((1,), (1,)), ((), ())),
                        preferred_element_type=jnp.float32) * (1.0 / math.sqrt(H))
    row_i = lax.broadcasted_iota(jnp.int32, (NT, NT), 0).astype(jnp.float32)
    col_i = lax.broadcasted_iota(jnp.int32, (NT, NT), 1).astype(jnp.float32)
    same_seq = (jnp.floor(row_i * (1.0 / T)) ==
                jnp.floor(col_i * (1.0 / T)))                  # (NT, NT) block mask
    s = jnp.where(same_seq, s, -jnp.inf)
    p = jax.nn.softmax(s, axis=-1)                             # exp(-inf)=0 off-block
    ctx = jnp.dot(p, v, preferred_element_type=jnp.float32)    # (NT, H)

    attn_out = (jnp.dot(ctx, w_ref[R_WO:R_WO + H, 0:H],
                        preferred_element_type=jnp.float32)
                + cst[_C_BO:_C_BO + 1, 0:H])
    h1 = _layer_norm(x + attn_out, ln1_g, ln1_b)               # (NT, H)

    # ---- feed-forward (elementwise math stays f32: v5e has no bf16 VPU/EUP) --
    # TODO(synk): PyTorch nn.GELU defaults to exact erf; tanh approximation kept
    # for guaranteed Mosaic lowering (~1e-3 difference).
    ff = jax.nn.gelu(jnp.dot(h1, w_ref[R_WFF1:R_WFF1 + H, 0:F],
                             preferred_element_type=jnp.float32)
                     + cst[_C_BFF1:_C_BFF1 + 1, 0:F])
    ff = (jnp.dot(ff, w_ref[R_WFF2:R_WFF2 + F, 0:H],
                  preferred_element_type=jnp.float32)
          + cst[_C_BFF2:_C_BFF2 + 1, 0:H])
    h2 = _layer_norm(h1 + ff, ln2_g, ln2_b)                    # (NT, H)

    # ---- pooler: dense + tanh on the [CLS] row of each sequence.
    #      One sublane-split reshape + middle-axis index (no unrolled concat).
    cls = h2.reshape(N, T, H)[:, 0, :]                         # (N, H)
    pooled = jnp.tanh(jnp.dot(cls, w_ref[R_WPOOL:R_WPOOL + H, 0:H],
                              preferred_element_type=jnp.float32)
                      + cst[_C_BPOOL:_C_BPOOL + 1, 0:H])       # (N, H)

    # ---- score_layer: Dropout(0.1) is identity in eval; Linear(H, 1) computed
    #      lane-major as a (1, N) row. Everything downstream (masked_fill / max
    #      / argmax / CE) stays on this lane row -> no lane<->sublane relayout.
    w_s = cst[_C_WSCORE:_C_WSCORE + 1, 0:H]                    # (1, H)
    b_s = cst[_C_BSCORE:_C_BSCORE + 1, 0:1]                    # (1, 1)
    scores_row = lax.dot_general(w_s, pooled, (((1,), (1,)), ((), ())),
                                 preferred_element_type=jnp.float32) + b_s  # (1, N)

    # masked_fill(-inf) + per-query max / first-index argmax / mean CE(target=0).
    # Precondition (same as the torch reference): input_lens[:, 0] > 0, else the
    # CE against target 0 is NaN by construction (pred then falls back to 0).
    masked_row = jnp.where(lens_ref[...] == 0, -jnp.inf, scores_row)    # (1, N)
    idx = lax.broadcasted_iota(jnp.int32, (1, C), 1)
    mx_parts, pred_parts = [], []
    loss_sum = jnp.zeros((1, 1), jnp.float32)
    for b in range(B):                                          # B=2 lane slices
        m_b = masked_row[:, b * C:(b + 1) * C]                  # (1, C)
        mx_b = jnp.max(m_b, axis=1, keepdims=True)              # (1, 1)
        pred_b = jnp.min(jnp.where(m_b == mx_b, idx, jnp.int32(C)),
                         axis=1, keepdims=True)                 # (1, 1) int32
        lse_b = mx_b + jnp.log(jnp.sum(jnp.exp(m_b - mx_b),
                                       axis=1, keepdims=True))  # (1, 1)
        loss_sum = loss_sum + (lse_b - m_b[:, 0:1])
        mx_parts.append(mx_b)
        pred_parts.append(pred_b.astype(jnp.float32))           # < C, exact in f32
    loss = loss_sum * (1.0 / B)                                 # (1, 1)

    # ---- ONE lane-dense full-width store of the packed result row ----
    filler = jnp.zeros((1, LANES - (_O_LOSS + 1)), jnp.float32)
    stats_ref[...] = jnp.concatenate(
        [masked_row] + mx_parts + pred_parts + [loss, filler], axis=1)


# --------------------------- wrappers ------------------------------
def run_full_ranker(x2d, weight_slab, lens_row):
    def vmem():
        return pl.BlockSpec(memory_space=pltpu.MemorySpace.VMEM)
    return pl.pallas_call(
        full_ranker_kernel,
        out_shape=jax.ShapeDtypeStruct((1, LANES), jnp.float32),
        in_specs=[vmem(), vmem(), vmem()],     # gridless: whole arrays in VMEM,
        out_specs=vmem(),                      # no pipeline bookkeeping
    )(x2d, weight_slab, lens_row)


def pack_operands(params):
    """Pack every weight / bias / LN / score constant into ONE lane-dense f32
    (SLAB_ROWS, 128) slab -> a single input DMA. Each MXU RHS starts at lane 0
    of its own row block. Call once and cache (outside the jitted fwd path)."""
    def pad_block(mat):
        m = jnp.asarray(mat, jnp.float32)
        return jnp.pad(m, ((0, 0), (0, LANES - m.shape[1])))

    def row(vec):
        v = jnp.asarray(vec, jnp.float32).reshape(1, -1)
        return jnp.pad(v, ((0, 0), (0, LANES - v.shape[1])))

    w_qkv = jnp.concatenate([params["w_attn"][i] for i in range(3)], axis=1)  # (H,3H)
    blocks = [
        pad_block(w_qkv),                              # rows [0, H)
        pad_block(params["w_attn"][3]),                # rows [H, 2H)   Wo @ lane 0
        pad_block(params["w_ffn1"]),                   # rows [2H, 3H)
        pad_block(params["w_ffn2"]),                   # rows [3H, 3H+F)
        pad_block(params["w_pool"]),                   # rows [.., ..+H)
        row(params["b_attn"][:3].reshape(1, 3 * H)),   # _C_BQKV
        row(params["b_attn"][3]),                      # _C_BO
        row(params["b_ffn1"]),                         # _C_BFF1
        row(params["b_ffn2"]),                         # _C_BFF2
    ]
    blocks += [row(params["ln"][i]) for i in range(6)]  # _C_LN .. _C_LN+5
    blocks += [row(params["b_pool"]),                   # _C_BPOOL
               row(params["w_score"].reshape(-1)),      # _C_WSCORE
               row(params["b_score"].reshape(-1))]      # _C_BSCORE
    slab = jnp.concatenate(blocks, axis=0)
    return jnp.pad(slab, ((0, SLAB_ROWS - slab.shape[0]), (0, 0)))


def full_ranker_forward(params, weight_slab, encoded_pairs, type_marks, input_lens):
    # ---- glue: embedding lookups (gather) stay in plain JAX ----
    # TODO(synk): token/type-id gather has no clean BlockSpec equivalent.
    ids = encoded_pairs.reshape(-1, T).astype(jnp.int32)        # (N, T)
    types = type_marks.reshape(-1, T).astype(jnp.int32)         # (N, T)
    x = (params["word_emb"][ids] + params["type_emb"][types]
         + params["pos_emb"][None, :, :]).astype(jnp.float32)   # (N, T, H)

    stats = run_full_ranker(x.reshape(NT, H), weight_slab,
                            input_lens.reshape(1, N).astype(jnp.int32))  # (1, 128)

    return {
        "loss": stats[0, _O_LOSS],
        "predictions": stats[0, _O_PRED:_O_PRED + B].astype(jnp.int32),
        "max_scores": stats[0, _O_MAX:_O_MAX + B],
        "scores": stats[0, _O_SCORES:_O_SCORES + N].reshape(B, C),
    }


# ------------------------ deterministic init ------------------------
def init_params(key):
    ks = jax.random.split(key, 12)
    nrm = lambda k, shape: (INIT_RANGE * jax.random.normal(k, shape)).astype(jnp.float32)
    ln = jnp.concatenate(
        [jnp.ones((1, H)), jnp.zeros((1, H))] * 3, axis=0).astype(jnp.float32)  # (6, H)
    return {
        "word_emb": nrm(ks[0], (VOCAB, H)),
        "type_emb": nrm(ks[1], (TYPE_VOCAB, H)),
        "pos_emb": nrm(ks[2], (T, H)),
        "w_attn": nrm(ks[3], (4, H, H)),           # q, k, v, out
        "b_attn": jnp.zeros((4, H), jnp.float32),
        "w_ffn1": nrm(ks[4], (H, F)),
        "b_ffn1": jnp.zeros((1, F), jnp.float32),
        "w_ffn2": nrm(ks[5], (F, H)),
        "b_ffn2": jnp.zeros((1, H), jnp.float32),
        "ln": ln,
        "w_pool": nrm(ks[6], (H, H)),
        "b_pool": jnp.zeros((1, H), jnp.float32),
        # score_layer[1]: weight ~ N(0, initializer_range), bias = 0
        "w_score": nrm(ks[7], (H, 1)),
        "b_score": jnp.zeros((1, 1), jnp.float32),
    }


# ------------------------------ main -------------------------------
if __name__ == "__main__":
    key = jax.random.PRNGKey(0)
    kp, k_ids, k_types = jax.random.split(key, 3)
    params = init_params(kp)
    weight_slab = pack_operands(params)    # packed once, cached with the params

    encoded_pairs = jax.random.randint(k_ids, (B, C, T), 0, VOCAB, jnp.int32)
    type_marks = jax.random.randint(k_types, (B, C, T), 0, TYPE_VOCAB, jnp.int32)
    # column 0 (the positive pair / CE target) always has nonzero length
    input_lens = jnp.array([[T, 5, 0, 3],
                            [T, 0, 4, 7]], jnp.int32)

    fwd = jax.jit(full_ranker_forward)
    out = fwd(params, weight_slab, encoded_pairs, type_marks, input_lens)
    jax.block_until_ready(out)
    assert out["loss"].shape == ()
    assert out["predictions"].shape == (B,)
    assert out["max_scores"].shape == (B,)
    assert out["scores"].shape == (B, C)
    print("KERNEL_OK")
</pallas_src>

<mosaic_0001>
module attributes {stable_mosaic.version = 11 : i64} {
  func.func @full_ranker_kernel(%arg0: memref<64x32xf32, #tpu.memory_space<vmem>>, %arg1: memref<208x128xf32, #tpu.memory_space<vmem>>, %arg2: memref<1x8xi32, #tpu.memory_space<vmem>>, %arg3: memref<1x128xf32, #tpu.memory_space<vmem>>) attributes {dimension_semantics = [], scalar_prefetch = 0 : i64, scratch_operands = 0 : i64, tpu.core_type = #tpu.core_type<tc>} {
    %c192 = arith.constant 192 : index
    %c0 = arith.constant 0 : index
    %0 = vector.load %arg1[%c192, %c0] : memref<208x128xf32, #tpu.memory_space<vmem>>, vector<16x128xf32>
    %1 = vector.extract_strided_slice %0 {offsets = [4, 0], sizes = [1, 32], strides = [1, 1]} : vector<16x128xf32> to vector<1x32xf32>
    %2 = vector.extract_strided_slice %0 {offsets = [5, 0], sizes = [1, 32], strides = [1, 1]} : vector<16x128xf32> to vector<1x32xf32>
    %3 = vector.extract_strided_slice %0 {offsets = [6, 0], sizes = [1, 32], strides = [1, 1]} : vector<16x128xf32> to vector<1x32xf32>
    %4 = vector.extract_strided_slice %0 {offsets = [7, 0], sizes = [1, 32], strides = [1, 1]} : vector<16x128xf32> to vector<1x32xf32>
    %5 = vector.extract_strided_slice %0 {offsets = [8, 0], sizes = [1, 32], strides = [1, 1]} : vector<16x128xf32> to vector<1x32xf32>
    %6 = vector.extract_strided_slice %0 {offsets = [9, 0], sizes = [1, 32], strides = [1, 1]} : vector<16x128xf32> to vector<1x32xf32>
    %c0_0 = arith.constant 0 : index
    %c0_1 = arith.constant 0 : index
    %7 = vector.load %arg0[%c0_0, %c0_1] : memref<64x32xf32, #tpu.memory_space<vmem>>, vector<64x32xf32>
    %cst = arith.constant dense<0.000000e+00> : vector<64xf32>
    %8 = vector.multi_reduction <add>, %7, %cst [1] : vector<64x32xf32> to vector<64xf32>
    %9 = vector.shape_cast %8 : vector<64xf32> to vector<64x1xf32>
    %cst_2 = arith.constant 3.200000e+01 : f32
    %10 = vector.broadcast %cst_2 : f32 to vector<64x1xf32>
    %11 = arith.divf %9, %10 : vector<64x1xf32>
    %12 = arith.mulf %7, %7 : vector<64x32xf32>
    %cst_3 = arith.constant dense<0.000000e+00> : vector<64xf32>
    %13 = vector.multi_reduction <add>, %12, %cst_3 [1] : vector<64x32xf32> to vector<64xf32>
    %14 = vector.shape_cast %13 : vector<64xf32> to vector<64x1xf32>
    %cst_4 = arith.constant 3.200000e+01 : f32
    %15 = vector.broadcast %cst_4 : f32 to vector<64x1xf32>
    %16 = arith.divf %14, %15 : vector<64x1xf32>
    %17 = arith.mulf %11, %11 : vector<64x1xf32>
    %18 = arith.subf %16, %17 : vector<64x1xf32>
    %cst_5 = arith.constant 0.000000e+00 : f32
    %19 = vector.broadcast %cst_5 : f32 to vector<64x1xf32>
    %20 = arith.maximumf %18, %19 : vector<64x1xf32>
    %21 = vector.broadcast %11 : vector<64x1xf32> to vector<64x32xf32>
    %22 = arith.subf %7, %21 : vector<64x32xf32>
    %cst_6 = arith.constant 9.99999996E-13 : f32
    %23 = vector.broadcast %cst_6 : f32 to vector<64x1xf32>
    %24 = arith.addf %20, %23 : vector<64x1xf32>
    %25 = math.rsqrt %24 : vector<64x1xf32>
    %26 = vector.broadcast %25 : vector<64x1xf32> to vector<64x32xf32>
    %27 = arith.mulf %22, %26 : vector<64x32xf32>
    %28 = vector.broadcast %1 : vector<1x32xf32> to vector<64x32xf32>
    %29 = arith.mulf %27, %28 : vector<64x32xf32>
    %30 = vector.broadcast %2 : vector<1x32xf32> to vector<64x32xf32>
    %31 = arith.addf %29, %30 : vector<64x32xf32>
    %c0_7 = arith.constant 0 : index
    %c0_8 = arith.constant 0 : index
    %32 = vector.load %arg1[%c0_7, %c0_8] : memref<208x128xf32, #tpu.memory_space<vmem>>, vector<32x128xf32>
    %cst_9 = arith.constant dense<0.000000e+00> : vector<64x128xf32>
    %33 = tpu.matmul %31, %32, %cst_9 {dimension_numbers = #tpu.dot_dimension_numbers<[1], [0], [0], [1], [0, 0, 1, 1], [], []>} : vector<64x32xf32>, vector<32x128xf32>, vector<64x128xf32> -> vector<64x128xf32>
    %34 = vector.extract_strided_slice %0 {offsets = [0, 0], sizes = [1, 128], strides = [1, 1]} : vector<16x128xf32> to vector<1x128xf32>
    %35 = vector.broadcast %34 : vector<1x128xf32> to vector<64x128xf32>
    %36 = arith.addf %33, %35 : vector<64x128xf32>
    %37 = vector.extract_strided_slice %36 {offsets = [0, 0], sizes = [64, 32], strides = [1, 1]} : vector<64x128xf32> to vector<64x32xf32>
    %38 = vector.extract_strided_slice %36 {offsets = [0, 32], sizes = [64, 32], strides = [1, 1]} : vector<64x128xf32> to vector<64x32xf32>
    %39 = vector.extract_strided_slice %36 {offsets = [0, 64], sizes = [64, 32], strides = [1, 1]} : vector<64x128xf32> to vector<64x32xf32>
    %cst_10 = arith.constant dense<0.000000e+00> : vector<64x64xf32>
    %40 = tpu.matmul %37, %38, %cst_10 {dimension_numbers = #tpu.dot_dimension_numbers<[1], [1], [0], [0], [0, 0, 1, 0], [], []>} : vector<64x32xf32>, vector<64x32xf32>, vector<64x64xf32> -> vector<64x64xf32>
    %cst_11 = arith.constant 0.176776692 : f32
    %41 = vector.broadcast %cst_11 : f32 to vector<64x64xf32>
    %42 = arith.mulf %40, %41 : vector<64x64xf32>
    %43 = tpu.iota {dimensions = array<i32: 0>} : vector<64x64xi32>
    %44 = arith.sitofp %43 : vector<64x64xi32> to vector<64x64xf32>
    %45 = tpu.iota {dimensions = array<i32: 1>} : vector<64x64xi32>
    %46 = arith.sitofp %45 : vector<64x64xi32> to vector<64x64xf32>
    %cst_12 = arith.constant 1.250000e-01 : f32
    %47 = vector.broadcast %cst_12 : f32 to vector<64x64xf32>
    %48 = arith.mulf %44, %47 : vector<64x64xf32>
    %49 = math.floor %48 : vector<64x64xf32>
    %cst_13 = arith.constant 1.250000e-01 : f32
    %50 = vector.broadcast %cst_13 : f32 to vector<64x64xf32>
    %51 = arith.mulf %46, %50 : vector<64x64xf32>
    %52 = math.floor %51 : vector<64x64xf32>
    %53 = arith.cmpf oeq, %49, %52 : vector<64x64xf32>
    %cst_14 = arith.constant 0xFF800000 : f32
    %54 = vector.broadcast %cst_14 : f32 to vector<64x64xf32>
    %55 = arith.select %53, %42, %54 : vector<64x64xi1>, vector<64x64xf32>
    %cst_15 = arith.constant dense<0xFF800000> : vector<64xf32>
    %56 = vector.multi_reduction <maximumf>, %55, %cst_15 [1] : vector<64x64xf32> to vector<64xf32>
    %cst_16 = arith.constant 0xFF800000 : f32
    %57 = vector.broadcast %cst_16 : f32 to vector<64xf32>
    %58 = arith.maximumf %57, %56 : vector<64xf32>
    %59 = vector.shape_cast %58 : vector<64xf32> to vector<64x1xf32>
    %60 = vector.broadcast %59 : vector<64x1xf32> to vector<64x64xf32>
    %61 = arith.subf %55, %60 : vector<64x64xf32>
    %62 = math.exp %61 : vector<64x64xf32>
    %cst_17 = arith.constant dense<0.000000e+00> : vector<64xf32>
    %63 = vector.multi_reduction <add>, %62, %cst_17 [1] : vector<64x64xf32> to vector<64xf32>
    %64 = vector.shape_cast %63 : vector<64xf32> to vector<64x1xf32>
    %65 = vector.broadcast %64 : vector<64x1xf32> to vector<64x64xf32>
    %66 = arith.divf %62, %65 : vector<64x64xf32>
    %cst_18 = arith.constant dense<0.000000e+00> : vector<64x32xf32>
    %67 = tpu.matmul %66, %39, %cst_18 {dimension_numbers = #tpu.dot_dimension_numbers<[1], [0], [0], [1], [0, 0, 1, 1], [], []>} : vector<64x64xf32>, vector<64x32xf32>, vector<64x32xf32> -> vector<64x32xf32>
    %c32 = arith.constant 32 : index
    %c0_19 = arith.constant 0 : index
    %68 = vector.load %arg1[%c32, %c0_19] : memref<208x128xf32, #tpu.memory_space<vmem>>, vector<32x32xf32>
    %cst_20 = arith.constant dense<0.000000e+00> : vector<64x32xf32>
    %69 = tpu.matmul %67, %68, %cst_20 {dimension_numbers = #tpu.dot_dimension_numbers<[1], [0], [0], [1], [0, 0, 1, 1], [], []>} : vector<64x32xf32>, vector<32x32xf32>, vector<64x32xf32> -> vector<64x32xf32>
    %70 = vector.extract_strided_slice %0 {offsets = [1, 0], sizes = [1, 32], strides = [1, 1]} : vector<16x128xf32> to vector<1x32xf32>
    %71 = vector.broadcast %70 : vector<1x32xf32> to vector<64x32xf32>
    %72 = arith.addf %69, %71 : vector<64x32xf32>
    %73 = arith.addf %31, %72 : vector<64x32xf32>
    %cst_21 = arith.constant dense<0.000000e+00> : vector<64xf32>
    %74 = vector.multi_reduction <add>, %73, %cst_21 [1] : vector<64x32xf32> to vector<64xf32>
    %75 = vector.shape_cast %74 : vector<64xf32> to vector<64x1xf32>
    %cst_22 = arith.constant 3.200000e+01 : f32
    %76 = vector.broadcast %cst_22 : f32 to vector<64x1xf32>
    %77 = arith.divf %75, %76 : vector<64x1xf32>
    %78 = arith.mulf %73, %73 : vector<64x32xf32>
    %cst_23 = arith.constant dense<0.000000e+00> : vector<64xf32>
    %79 = vector.multi_reduction <add>, %78, %cst_23 [1] : vector<64x32xf32> to vector<64xf32>
    %80 = vector.shape_cast %79 : vector<64xf32> to vector<64x1xf32>
    %cst_24 = arith.constant 3.200000e+01 : f32
    %81 = vector.broadcast %cst_24 : f32 to vector<64x1xf32>
    %82 = arith.divf %80, %81 : vector<64x1xf32>
    %83 = arith.mulf %77, %77 : vector<64x1xf32>
    %84 = arith.subf %82, %83 : vector<64x1xf32>
    %cst_25 = arith.constant 0.000000e+00 : f32
    %85 = vector.broadcast %cst_25 : f32 to vector<64x1xf32>
    %86 = arith.maximumf %84, %85 : vector<64x1xf32>
    %87 = vector.broadcast %77 : vector<64x1xf32> to vector<64x32xf32>
    %88 = arith.subf %73, %87 : vector<64x32xf32>
    %cst_26 = arith.constant 9.99999996E-13 : f32
    %89 = vector.broadcast %cst_26 : f32 to vector<64x1xf32>
    %90 = arith.addf %86, %89 : vector<64x1xf32>
    %91 = math.rsqrt %90 : vector<64x1xf32>
    %92 = vector.broadcast %91 : vector<64x1xf32> to vector<64x32xf32>
    %93 = arith.mulf %88, %92 : vector<64x32xf32>
    %94 = vector.broadcast %3 : vector<1x32xf32> to vector<64x32xf32>
    %95 = arith.mulf %93, %94 : vector<64x32xf32>
    %96 = vector.broadcast %4 : vector<1x32xf32> to vector<64x32xf32>
    %97 = arith.addf %95, %96 : vector<64x32xf32>
    %c64 = arith.constant 64 : index
    %c0_27 = arith.constant 0 : index
    %98 = vector.load %arg1[%c64, %c0_27] : memref<208x128xf32, #tpu.memory_space<vmem>>, vector<32x64xf32>
    %cst_28 = arith.constant dense<0.000000e+00> : vector<64x64xf32>
    %99 = tpu.matmul %97, %98, %cst_28 {dimension_numbers = #tpu.dot_dimension_numbers<[1], [0], [0], [1], [0, 0, 1, 1], [], []>} : vector<64x32xf32>, vector<32x64xf32>, vector<64x64xf32> -> vector<64x64xf32>
    %100 = vector.extract_strided_slice %0 {offsets = [2, 0], sizes = [1, 64], strides = [1, 1]} : vector<16x128xf32> to vector<1x64xf32>
    %101 = vector.broadcast %100 : vector<1x64xf32> to vector<64x64xf32>
    %102 = arith.addf %99, %101 : vector<64x64xf32>
    %103 = arith.mulf %102, %102 : vector<64x64xf32>
    %104 = arith.mulf %102, %103 : vector<64x64xf32>
    %cst_29 = arith.constant 4.471500e-02 : f32
    %105 = vector.broadcast %cst_29 : f32 to vector<64x64xf32>
    %106 = arith.mulf %105, %104 : vector<64x64xf32>
    %107 = arith.addf %102, %106 : vector<64x64xf32>
    %cst_30 = arith.constant 0.797884583 : f32
    %108 = vector.broadcast %cst_30 : f32 to vector<64x64xf32>
    %109 = arith.mulf %108, %107 : vector<64x64xf32>
    %110 = math.tanh %109 : vector<64x64xf32>
    %cst_31 = arith.constant 1.000000e+00 : f32
    %111 = vector.broadcast %cst_31 : f32 to vector<64x64xf32>
    %112 = arith.addf %111, %110 : vector<64x64xf32>
    %cst_32 = arith.constant 5.000000e-01 : f32
    %113 = vector.broadcast %cst_32 : f32 to vector<64x64xf32>
    %114 = arith.mulf %113, %112 : vector<64x64xf32>
    %115 = arith.mulf %102, %114 : vector<64x64xf32>
    %c96 = arith.constant 96 : index
    %c0_33 = arith.constant 0 : index
    %116 = vector.load %arg1[%c96, %c0_33] : memref<208x128xf32, #tpu.memory_space<vmem>>, vector<64x32xf32>
    %cst_34 = arith.constant dense<0.000000e+00> : vector<64x32xf32>
    %117 = tpu.matmul %115, %116, %cst_34 {dimension_numbers = #tpu.dot_dimension_numbers<[1], [0], [0], [1], [0, 0, 1, 1], [], []>} : vector<64x64xf32>, vector<64x32xf32>, vector<64x32xf32> -> vector<64x32xf32>
    %118 = vector.extract_strided_slice %0 {offsets = [3, 0], sizes = [1, 32], strides = [1, 1]} : vector<16x128xf32> to vector<1x32xf32>
    %119 = vector.broadcast %118 : vector<1x32xf32> to vector<64x32xf32>
    %120 = arith.addf %117, %119 : vector<64x32xf32>
    %121 = arith.addf %97, %120 : vector<64x32xf32>
    %cst_35 = arith.constant dense<0.000000e+00> : vector<64xf32>
    %122 = vector.multi_reduction <add>, %121, %cst_35 [1] : vector<64x32xf32> to vector<64xf32>
    %123 = vector.shape_cast %122 : vector<64xf32> to vector<64x1xf32>
    %cst_36 = arith.constant 3.200000e+01 : f32
    %124 = vector.broadcast %cst_36 : f32 to vector<64x1xf32>
    %125 = arith.divf %123, %124 : vector<64x1xf32>
    %126 = arith.mulf %121, %121 : vector<64x32xf32>
    %cst_37 = arith.constant dense<0.000000e+00> : vector<64xf32>
    %127 = vector.multi_reduction <add>, %126, %cst_37 [1] : vector<64x32xf32> to vector<64xf32>
    %128 = vector.shape_cast %127 : vector<64xf32> to vector<64x1xf32>
    %cst_38 = arith.constant 3.200000e+01 : f32
    %129 = vector.broadcast %cst_38 : f32 to vector<64x1xf32>
    %130 = arith.divf %128, %129 : vector<64x1xf32>
    %131 = arith.mulf %125, %125 : vector<64x1xf32>
    %132 = arith.subf %130, %131 : vector<64x1xf32>
    %cst_39 = arith.constant 0.000000e+00 : f32
    %133 = vector.broadcast %cst_39 : f32 to vector<64x1xf32>
    %134 = arith.maximumf %132, %133 : vector<64x1xf32>
    %135 = vector.broadcast %125 : vector<64x1xf32> to vector<64x32xf32>
    %136 = arith.subf %121, %135 : vector<64x32xf32>
    %cst_40 = arith.constant 9.99999996E-13 : f32
    %137 = vector.broadcast %cst_40 : f32 to vector<64x1xf32>
    %138 = arith.addf %134, %137 : vector<64x1xf32>
    %139 = math.rsqrt %138 : vector<64x1xf32>
    %140 = vector.broadcast %139 : vector<64x1xf32> to vector<64x32xf32>
    %141 = arith.mulf %136, %140 : vector<64x32xf32>
    %142 = vector.broadcast %5 : vector<1x32xf32> to vector<64x32xf32>
    %143 = arith.mulf %141, %142 : vector<64x32xf32>
    %144 = vector.broadcast %6 : vector<1x32xf32> to vector<64x32xf32>
    %145 = arith.addf %143, %144 : vector<64x32xf32>
    %146 = vector.shape_cast %145 : vector<64x32xf32> to vector<8x8x32xf32>
    %147 = vector.extract_strided_slice %146 {offsets = [0, 0, 0], sizes = [8, 1, 32], strides = [1, 1, 1]} : vector<8x8x32xf32> to vector<8x1x32xf32>
    %148 = vector.shape_cast %147 : vector<8x1x32xf32> to vector<8x32xf32>
    %c160 = arith.constant 160 : index
    %c0_41 = arith.constant 0 : index
    %149 = vector.load %arg1[%c160, %c0_41] : memref<208x128xf32, #tpu.memory_space<vmem>>, vector<32x32xf32>
    %cst_42 = arith.constant dense<0.000000e+00> : vector<8x32xf32>
    %150 = tpu.matmul %148, %149, %cst_42 {dimension_numbers = #tpu.dot_dimension_numbers<[1], [0], [0], [1], [0, 0, 1, 1], [], []>} : vector<8x32xf32>, vector<32x32xf32>, vector<8x32xf32> -> vector<8x32xf32>
    %151 = vector.extract_strided_slice %0 {offsets = [10, 0], sizes = [1, 32], strides = [1, 1]} : vector<16x128xf32> to vector<1x32xf32>
    %152 = vector.broadcast %151 : vector<1x32xf32> to vector<8x32xf32>
    %153 = arith.addf %150, %152 : vector<8x32xf32>
    %154 = math.tanh %153 : vector<8x32xf32>
    %155 = vector.extract_strided_slice %0 {offsets = [11, 0], sizes = [1, 32], strides = [1, 1]} : vector<16x128xf32> to vector<1x32xf32>
    %156 = vector.extract_strided_slice %0 {offsets = [12, 0], sizes = [1, 1], strides = [1, 1]} : vector<16x128xf32> to vector<1x1xf32>
    %cst_43 = arith.constant dense<0.000000e+00> : vector<1x8xf32>
    %157 = tpu.matmul %155, %154, %cst_43 {dimension_numbers = #tpu.dot_dimension_numbers<[1], [1], [0], [0], [0, 0, 1, 0], [], []>} : vector<1x32xf32>, vector<8x32xf32>, vector<1x8xf32> -> vector<1x8xf32>
    %158 = vector.broadcast %156 : vector<1x1xf32> to vector<1x8xf32>
    %159 = arith.addf %157, %158 : vector<1x8xf32>
    %c0_44 = arith.constant 0 : index
    %c0_45 = arith.constant 0 : index
    %160 = vector.load %arg2[%c0_44, %c0_45] : memref<1x8xi32, #tpu.memory_space<vmem>>, vector<1x8xi32>
    %c0_i32 = arith.constant 0 : i32
    %161 = vector.broadcast %c0_i32 : i32 to vector<1x8xi32>
    %162 = arith.cmpi eq, %160, %161 : vector<1x8xi32>
    %cst_46 = arith.constant 0xFF800000 : f32
    %163 = vector.broadcast %cst_46 : f32 to vector<1x8xf32>
    %164 = arith.select %162, %163, %159 : vector<1x8xi1>, vector<1x8xf32>
    %165 = tpu.iota {dimensions = array<i32: 1>} : vector<1x4xi32>
    %cst_47 = arith.constant 0.000000e+00 : f32
    %166 = vector.broadcast %cst_47 : f32 to vector<1x1xf32>
    %167 = vector.extract_strided_slice %164 {offsets = [0, 0], sizes = [1, 4], strides = [1, 1]} : vector<1x8xf32> to vector<1x4xf32>
    %cst_48 = arith.constant dense<0xFF800000> : vector<1xf32>
    %168 = vector.multi_reduction <maximumf>, %167, %cst_48 [1] : vector<1x4xf32> to vector<1xf32>
    %169 = vector.shape_cast %168 : vector<1xf32> to vector<1x1xf32>
    %170 = vector.broadcast %169 : vector<1x1xf32> to vector<1x4xf32>
    %171 = arith.cmpf oeq, %167, %170 : vector<1x4xf32>
    %c4_i32 = arith.constant 4 : i32
    %172 = vector.broadcast %c4_i32 : i32 to vector<1x4xi32>
    %173 = arith.select %171, %165, %172 : vector<1x4xi1>, vector<1x4xi32>
    %cst_49 = arith.constant dense<2147483647> : vector<1xi32>
    %174 = vector.multi_reduction <minsi>, %173, %cst_49 [1] : vector<1x4xi32> to vector<1xi32>
    %175 = vector.shape_cast %174 : vector<1xi32> to vector<1x1xi32>
    %176 = vector.broadcast %169 : vector<1x1xf32> to vector<1x4xf32>
    %177 = arith.subf %167, %176 : vector<1x4xf32>
    %178 = math.exp %177 : vector<1x4xf32>
    %cst_50 = arith.constant dense<0.000000e+00> : vector<1xf32>
    %179 = vector.multi_reduction <add>, %178, %cst_50 [1] : vector<1x4xf32> to vector<1xf32>
    %180 = vector.shape_cast %179 : vector<1xf32> to vector<1x1xf32>
    %181 = math.log %180 : vector<1x1xf32>
    %182 = arith.addf %169, %181 : vector<1x1xf32>
    %183 = vector.extract_strided_slice %167 {offsets = [0, 0], sizes = [1, 1], strides = [1, 1]} : vector<1x4xf32> to vector<1x1xf32>
    %184 = arith.subf %182, %183 : vector<1x1xf32>
    %185 = arith.addf %166, %184 : vector<1x1xf32>
    %186 = arith.sitofp %175 : vector<1x1xi32> to vector<1x1xf32>
    %187 = vector.extract_strided_slice %164 {offsets = [0, 4], sizes = [1, 4], strides = [1, 1]} : vector<1x8xf32> to vector<1x4xf32>
    %cst_51 = arith.constant dense<0xFF800000> : vector<1xf32>
    %188 = vector.multi_reduction <maximumf>, %187, %cst_51 [1] : vector<1x4xf32> to vector<1xf32>
    %189 = vector.shape_cast %188 : vector<1xf32> to vector<1x1xf32>
    %190 = vector.broadcast %189 : vector<1x1xf32> to vector<1x4xf32>
    %191 = arith.cmpf oeq, %187, %190 : vector<1x4xf32>
    %c4_i32_52 = arith.constant 4 : i32
    %192 = vector.broadcast %c4_i32_52 : i32 to vector<1x4xi32>
    %193 = arith.select %191, %165, %192 : vector<1x4xi1>, vector<1x4xi32>
    %cst_53 = arith.constant dense<2147483647> : vector<1xi32>
    %194 = vector.multi_reduction <minsi>, %193, %cst_53 [1] : vector<1x4xi32> to vector<1xi32>
    %195 = vector.shape_cast %194 : vector<1xi32> to vector<1x1xi32>
    %196 = vector.broadcast %189 : vector<1x1xf32> to vector<1x4xf32>
    %197 = arith.subf %187, %196 : vector<1x4xf32>
    %198 = math.exp %197 : vector<1x4xf32>
    %cst_54 = arith.constant dense<0.000000e+00> : vector<1xf32>
    %199 = vector.multi_reduction <add>, %198, %cst_54 [1] : vector<1x4xf32> to vector<1xf32>
    %200 = vector.shape_cast %199 : vector<1xf32> to vector<1x1xf32>
    %201 = math.log %200 : vector<1x1xf32>
    %202 = arith.addf %189, %201 : vector<1x1xf32>
    %203 = vector.extract_strided_slice %187 {offsets = [0, 0], sizes = [1, 1], strides = [1, 1]} : vector<1x4xf32> to vector<1x1xf32>
    %204 = arith.subf %202, %203 : vector<1x1xf32>
    %205 = arith.addf %185, %204 : vector<1x1xf32>
    %206 = arith.sitofp %195 : vector<1x1xi32> to vector<1x1xf32>
    %cst_55 = arith.constant 5.000000e-01 : f32
    %207 = vector.broadcast %cst_55 : f32 to vector<1x1xf32>
    %208 = arith.mulf %205, %207 : vector<1x1xf32>
    %cst_56 = arith.constant 0.000000e+00 : f32
    %209 = vector.broadcast %cst_56 : f32 to vector<1x115xf32>
    %210 = tpu.concatenate %164, %169, %189, %186, %206, %208, %209 in 1 : vector<1x8xf32>, vector<1x1xf32>, vector<1x1xf32>, vector<1x1xf32>, vector<1x1xf32>, vector<1x1xf32>, vector<1x115xf32> -> vector<1x128xf32>
    %c0_57 = arith.constant 0 : index
    %c0_58 = arith.constant 0 : index
    %211 = vector.load %arg3[%c0_57, %c0_58] : memref<1x128xf32, #tpu.memory_space<vmem>>, vector<1x128xf32>
    tpu.vector_store %arg3[%c0_57, %c0_58], %210 {strides = array<i32>} : memref<1x128xf32, #tpu.memory_space<vmem>>, vector<1x128xf32>,
    return
  }
}

</mosaic_0001>

<bundles_post_ra>
// kernel: squeeze.7
= control target key start
LH: loop header
LB: loop body
LE: loop exit
PB: predicated region body
PF: predicated region fallthrough
CT: control target
= control target key end

     0   :  { %s85_s0 = inlined_call_operand.vmem [shape: f32[8], index: 0, kind: input, shape index: {}]   ;;  %s86_s1 = inlined_call_operand.hbm [shape: f32[2,4], index: 1, kind: output, shape index: {}]  }
   0x1   :  { %v5_v0 = vld [vmem:[%s85_s0] sm:$0x1] }
   0x2   :  { %2 = vsyncpa [#allocation1], 0  ;;  %6 = vst [vmem:[#allocation3] sm:$0x1] %v5_v0  ;;  %vm8_vm0 = vcmask 31744   ;;  %s58_s0 = smov 124  }
   0x3   :  { %s59_s8 = smov [#allocation0]  }
   0x4   :  { %s26_s9 = sshll.u32 %s59_s8, 4  ;;  %s27_s9 = int_to_ptr.vmem [resolvable:$true] %s26_s9 }
   0x5   :  { %s34_s10 = scalar_lea.vmem %s27_s9, 32  ;;  %p39_p1 = scmp.lt.s32.totalorder %s27_s9, %s27_s9 }
   0x6   :  { %p35_p0 = scmp.ne.s32.totalorder %s27_s9, %s34_s10  ;;  %p40_p2 = scmp.lt.s32.totalorder %s34_s10, %s34_s10 }
   0x8   :  { %p41_p3 = por %p40_p2, %p39_p1 }
   0x9   :  { %v10_v1 = vld [vmem:[#allocation3] sm:$0x1]  }
   0xa   :  { %v7_v2 = vld [vmem:[#allocation3] sm:$0x1]   ;;  %11 = vrot.lane.b32.xlu0 %v10_v1, %s58_s0  ;;  %p42_p4 = pnand %p41_p3, %p35_p0 }
   0xb   :  { %9 = vst.msk [vmem:[#allocation2] sm:$0x1] %vm8_vm0, %v7_v2  }
  0x7c   :  { %v12_v3 = vpop.permute.xlu0 %11  }
  0x7d   :  { %15 = vst.msk [vmem:[#allocation2 + $0x1] sm:$0x1] %vm8_vm0, %v12_v3  }
  0x84   :  { %v19_v4 = vld [vmem:[#allocation2] sm:$0x3] }
  0x85   :  { %21 = vst [vmem:[#allocation0] sm:$0x3] %v19_v4 }
  0x86   :  { %45 = shalt.err (!%p42_p4)
}
  0x87   :  { %s46_s13 = scalar_lea.hbm %s86_s1, 32 }
  0x88   :  { %p47_p5 = scmp.ne.s32.totalorder %s86_s1, %s46_s13  ;;  %p50_p6 = scmp.lt.u32.totalorder %s46_s13, %s86_s1 }
  0x8a   :  { %p52_p7 = pnand %p50_p6, %p47_p5 }
  0x8c   :  { %55 = shalt.err (!%p52_p7)
}
  0x8d   :  { %29 = dma.vmem_to_hbm [thread:$0]  %s27_s9, 32, %s86_s1, [#allocation1]  }
  0x8e   :  { %56 = dma.done.wait [#allocation1], 32  }
  0x8f   :  { %57 = vsyncadd [#allocation1], 4294967264 }
  0x90   :  { %31 = vsyncpa [#allocation1], 1 }

// kernel: full_ranker_forward.1
= control target key start
LH: loop header
LB: loop body
LE: loop exit
PB: predicated region body
PF: predicated region fallthrough
CT: control target
= control target key end

     0   :  { %vm24_vm0 = vcmask 261120   ;;  %v154_v51 = vlaneseq  ;;  %s2456_s10 = smov 96   ;;  %vm538_vm3 = vcmask 523264   ;;  %s2457_s11 = smov 64   ;;  %vm2459_vm11 = vmmov 0   ;;  %s3203_s0 = inlined_call_operand.vmem [shape: f32[64,32], index: 0, kind: input, shape index: {}]   ;;  %s3204_s1 = inlined_call_operand.vmem [shape: f32[208,128], index: 1, kind: input, shape index: {}]   ;;  %s3205_s2 = inlined_call_operand.vmem [shape: s32[1,8], index: 2, kind: input, shape index: {}]   ;;  %s3206_s3 = inlined_call_operand.vmem [shape: f32[1,128], index: 3, kind: output, shape index: {}]  }
   0x1   :  { %v2489_v0 = vld [vmem:[%s3203_s0] sm:$0xff]  ;;  %v2494_v1 = vld [vmem:[%s3203_s0 + $0x8] sm:$0xff]  ;;  %v2508_v7 = vld [vmem:[%s3203_s0 + $0x10] sm:$0xff]  ;;  %vm1604_vm12 = vcmask 1041409   ;;  %vm1607_vm13 = vcmask 1042434   ;;  %vm1610_vm14 = vcmask 1043459  }
   0x2   :  { %v25_v2 = vsel %vm24_vm0, %v2489_v0, 0.0  ;;  %v58_v3 = vmul.f32 %v2489_v0, %v2489_v0  ;;  %v59_v4 = vmul.f32 %v2494_v1, %v2494_v1  ;;  %v28_v6 = vsel %vm24_vm0, %v2494_v1, 0.0  ;;  %v2514_v9 = vld [vmem:[%s3203_s0 + $0x18] sm:$0xff]  ;;  %v2528_v15 = vld [vmem:[%s3203_s0 + $0x20] sm:$0xff]  ;;  %v2534_v17 = vld [vmem:[%s3203_s0 + $0x28] sm:$0xff]  ;;  %s2464_s28 = smov 124  }
   0x3   :  { %26 = vadd.xlane.f32.xlu0 %v25_v2  ;;  %v31_v10 = vsel %vm24_vm0, %v2508_v7, 0.0  ;;  %v60_v11 = vmul.f32 %v2508_v7, %v2508_v7  ;;  %v34_v12 = vsel %vm24_vm0, %v2514_v9, 0.0  ;;  %v61_v13 = vmul.f32 %v2514_v9, %v2514_v9  ;;  %v2548_v23 = vld [vmem:[%s3203_s0 + $0x30] sm:$0xff]  ;;  %v2554_v25 = vld [vmem:[%s3203_s0 + $0x38] sm:$0xff]  ;;  %v178_v32 = vld [vmem:[%s3204_s1] sm:$0xff]  ;;  %s2465_s29 = smov 12  }
   0x4   :  { %v66_v5 = vsel %vm24_vm0, %v58_v3, 0.0  ;;  %v69_v8 = vsel %vm24_vm0, %v59_v4, 0.0  ;;  %v37_v18 = vsel %vm24_vm0, %v2528_v15, 0.0  ;;  %v62_v19 = vmul.f32 %v2528_v15, %v2528_v15  ;;  %v179_v33 = vld [vmem:[%s3204_s1 + $0x8] sm:$0xff]  ;;  %v180_v35 = vld [vmem:[%s3204_s1 + $0x10] sm:$0xff]  ;;  %v181_v36 = vld [vmem:[%s3204_s1 + $0x18] sm:$0xff] }
   0x5   :  { %67 = vadd.xlane.f32.xlu1 %v66_v5  ;;  %v72_v14 = vsel %vm24_vm0, %v60_v11, 0.0  ;;  %v75_v16 = vsel %vm24_vm0, %v61_v13, 0.0  ;;  %v40_v20 = vsel %vm24_vm0, %v2534_v17, 0.0  ;;  %v63_v21 = vmul.f32 %v2534_v17, %v2534_v17  ;;  %vm2690_vm1 = vmpackc.low %vm24_vm0, %vm24_vm0 }
   0x6   :  { %v78_v22 = vsel %vm24_vm0, %v62_v19, 0.0  ;;  %v43_v26 = vsel %vm24_vm0, %v2548_v23, 0.0  ;;  %v64_v27 = vmul.f32 %v2548_v23, %v2548_v23  ;;  %v46_v28 = vsel %vm24_vm0, %v2554_v25, 0.0 }
   0x7   :  { %29 = vadd.xlane.f32.xlu0 %v28_v6  ;;  %v81_v24 = vsel %vm24_vm0, %v63_v21, 0.0  ;;  %v65_v29 = vmul.f32 %v2554_v25, %v2554_v25  ;;  %v2212_v34 = vpack.c.bf16 %v179_v33, %v178_v32  ;;  %v2216_v37 = vpack.c.bf16 %v181_v36, %v180_v35 }
   0x8   :  { %v84_v30 = vsel %vm24_vm0, %v64_v27, 0.0  ;;  %v2585_v60 = vshrl.u32 %v154_v51, 7  ;;  %vm1613_vm15 = vcmask 1044484  }
   0x9   :  { %70 = vadd.xlane.f32.xlu1 %v69_v8  ;;  %v87_v31 = vsel %vm24_vm0, %v65_v29, 0.0  ;;  %2213 = vmatprep.subr.bf16.mxu0 %v2212_v34 }
   0xa   :  { %2215 = vmatpush3.bf16.msra.mxu0 %v2212_v34  ;;  %v156_v6 = vsub.s32 4, %v2585_v60 }
   0xb   :  { %32 = vadd.xlane.f32.xlu0 %v31_v10  ;;  %2217 = vmatprep.subr.bf16.mxu0 %v2216_v37 }
   0xd   :  { %35 = vadd.xlane.f32.xlu1 %v34_v12  ;;  %v2595_v12 = vld [vmem:[%s3204_s1 + $0xc0] sm:$0xff] }
   0xe   :  { %2219 = vmatpush3.bf16.msra.mxu0 %v2216_v37 }
   0xf   :  { %73 = vadd.xlane.f32.xlu0 %v72_v14  ;;  %v168_v14 = vsub.s32 5, %v2585_v60 }
  0x11   :  { %76 = vadd.xlane.f32.xlu1 %v75_v16 }
  0x13   :  { %38 = vadd.xlane.f32.xlu0 %v37_v18 }
  0x15   :  { %41 = vadd.xlane.f32.xlu1 %v40_v20 }
  0x17   :  { %79 = vadd.xlane.f32.xlu0 %v78_v22 }
  0x19   :  { %82 = vadd.xlane.f32.xlu1 %v81_v24  ;;  %v2604_v24 = vrot.slane %v2595_v12, %v156_v6 }
  0x1b   :  { %44 = vadd.xlane.f32.xlu0 %v43_v26 }
  0x1d   :  { %47 = vadd.xlane.f32.xlu1 %v46_v28 }
  0x1f   :  { %85 = vadd.xlane.f32.xlu0 %v84_v30 }
  0x21   :  { %88 = vadd.xlane.f32.xlu1 %v87_v31  ;;  %v2607_v31 = vrot.slane %v2595_v12, %v168_v14 }
  0x90   :  { %v27_v38 = vpop.xlane.xlu0 %26 }
  0x91   :  { %v50_v39 = vmul.f32 0.03125, %v27_v38 }
  0x92   :  { %v68_v40 = vpop.xlane.xlu1 %67 }
  0x93   :  { %v98_v41 = vmul.f32 %v50_v39, %v50_v39  ;;  %v90_v42 = vmul.f32 0.03125, %v68_v40  ;;  %v122_v20 = vsub.f32 %v2489_v0, %v50_v39 }
  0x94   :  { %v30_v43 = vpop.xlane.xlu0 %29 }
  0x95   :  { %v106_v44 = vsub.f32 %v90_v42, %v98_v41  ;;  %v51_v45 = vmul.f32 0.03125, %v30_v43 }
  0x96   :  { %v71_v46 = vpop.xlane.xlu1 %70 }
  0x97   :  { %v114_v47 = vmax.f32 %v106_v44, 0.0  ;;  %v99_v48 = vmul.f32 %v51_v45, %v51_v45  ;;  %v91_v49 = vmul.f32 0.03125, %v71_v46  ;;  %v123_v34 = vsub.f32 %v2494_v1, %v51_v45 }
  0x98   :  { %v33_v50 = vpop.xlane.xlu0 %32 }
  0x99   :  { %v130_v52 = vadd.f32 1e-12, %v114_v47  ;;  %v107_v53 = vsub.f32 %v91_v49, %v99_v48  ;;  %v2578_v54 = vmul.f32 0.03125, %v33_v50 }
  0x9a   :  { %v36_v55 = vpop.xlane.xlu1 %35 }
  0x9b   :  { %2349 = vrsqrt.f32 %v130_v52  ;;  %v115_v56 = vmax.f32 %v107_v53, 0.0  ;;  %v100_v57 = vmul.f32 %v2578_v54, %v2578_v54  ;;  %v2582_v58 = vmul.f32 0.03125, %v36_v55 }
  0x9c   :  { %v74_v59 = vpop.xlane.xlu0 %73  ;;  %v124_v52 = vsub.f32 %v2508_v7, %v2578_v54 }
  0x9d   :  { %v131_v61 = vadd.f32 1e-12, %v115_v56  ;;  %v92_v62 = vmul.f32 0.03125, %v74_v59  ;;  %v101_v2 = vmul.f32 %v2582_v58, %v2582_v58 }
  0x9e   :  { %v77_v63 = vpop.xlane.xlu1 %76 }
  0x9f   :  { %2351 = vrsqrt.f32 %v131_v61  ;;  %v108_v3 = vsub.f32 %v92_v62, %v100_v57  ;;  %v93_v4 = vmul.f32 0.03125, %v77_v63  ;;  %v125_v62 = vsub.f32 %v2514_v9, %v2582_v58 }
  0xa0   :  { %v39_v5 = vpop.xlane.xlu0 %38 }
  0xa1   :  { %v116_v8 = vmax.f32 %v108_v3, 0.0  ;;  %v109_v10 = vsub.f32 %v93_v4, %v101_v2  ;;  %v2590_v11 = vmul.f32 0.03125, %v39_v5 }
  0xa2   :  { %v42_v13 = vpop.xlane.xlu1 %41 }
  0xa3   :  { %v132_v16 = vadd.f32 1e-12, %v116_v8  ;;  %v117_v18 = vmax.f32 %v109_v10, 0.0  ;;  %v102_v19 = vmul.f32 %v2590_v11, %v2590_v11  ;;  %v2601_v21 = vmul.f32 0.03125, %v42_v13 }
  0xa4   :  { %v80_v22 = vpop.xlane.xlu0 %79  ;;  %v126_v9 = vsub.f32 %v2528_v15, %v2590_v11 }
  0xa5   :  { %v2350_v26 = vpop.eup %2349  ;;  %2353 = vrsqrt.f32 %v132_v16  ;;  %v133_v27 = vadd.f32 1e-12, %v117_v18  ;;  %v94_v28 = vmul.f32 0.03125, %v80_v22  ;;  %v103_v32 = vmul.f32 %v2601_v21, %v2601_v21 }
  0xa6   :  { %v83_v29 = vpop.xlane.xlu1 %82  ;;  %v146_v30 = vmul.f32 %v2350_v26, %v122_v20  ;;  %v127_v16 = vsub.f32 %v2534_v17, %v2601_v21 }
  0xa7   :  { %2355 = vrsqrt.f32 %v133_v27  ;;  %v110_v0 = vsub.f32 %v94_v28, %v102_v19  ;;  %v95_v33 = vmul.f32 0.03125, %v83_v29 }
  0xa8   :  { %v45_v35 = vpop.xlane.xlu0 %44  ;;  %v158_v36 = vmul.f32 %v2604_v24, %v146_v30 }
  0xa9   :  { %v2352_v37 = vpop.eup %2351  ;;  %v118_v38 = vmax.f32 %v110_v0, 0.0  ;;  %v111_v39 = vsub.f32 %v95_v33, %v103_v32  ;;  %v56_v40 = vmul.f32 0.03125, %v45_v35 }
  0xaa   :  { %v48_v41 = vpop.xlane.xlu1 %47  ;;  %v2614_v42 = vadd.f32 %v2607_v31, %v158_v36  ;;  %v147_v43 = vmul.f32 %v2352_v37, %v123_v34 }
  0xab   :  { %v134_v44 = vadd.f32 1e-12, %v118_v38  ;;  %v119_v46 = vmax.f32 %v111_v39, 0.0  ;;  %v104_v47 = vmul.f32 %v56_v40, %v56_v40  ;;  %v57_v48 = vmul.f32 0.03125, %v48_v41 }
  0xac   :  { %2060 = vmatprep.mubr.msk.f32.mxu0 %vm24_vm0, %v2614_v42  ;;  %v86_v1 = vpop.xlane.xlu0 %85  ;;  %v159_v45 = vmul.f32 %v2604_v24, %v147_v43  ;;  %v128_v26 = vsub.f32 %v2548_v23, %v56_v40 }
  0xad   :  { %2357 = vrsqrt.f32 %v134_v44  ;;  %v135_v49 = vadd.f32 1e-12, %v119_v46  ;;  %v96_v50 = vmul.f32 0.03125, %v86_v1  ;;  %v105_v57 = vmul.f32 %v57_v48, %v57_v48 }
  0xae   :  { %v89_v53 = vpop.xlane.xlu1 %88  ;;  %v2622_v55 = vadd.f32 %v2607_v31, %v159_v45  ;;  %v129_v27 = vsub.f32 %v2554_v25, %v57_v48  ;;  %v2671_v25 = vsub.s32 0, %v2585_v60 }
  0xaf   :  { %v2354_v56 = vpop.eup %2353  ;;  %2359 = vrsqrt.f32 %v135_v49  ;;  %v112_v59 = vsub.f32 %v96_v50, %v104_v47  ;;  %v97_v61 = vmul.f32 0.03125, %v89_v53 }
  0xb0   :  { %2061 = vmatmul.mubr.msk.f32.vlgmr.msra.gmra.mrb[0].mxu0 %vm24_vm0, %v2622_v55  ;;  %v148_v63 = vmul.f32 %v2354_v56, %v124_v52  ;;  %v185_v34 = vrot.slane %v2595_v12, %v2671_v25 }
  0xb1   :  { %v2356_v2 = vpop.eup %2355  ;;  %v120_v3 = vmax.f32 %v112_v59, 0.0  ;;  %v113_v4 = vsub.f32 %v97_v61, %v105_v57 }
  0xb2   :  { %v160_v7 = vmul.f32 %v2604_v24, %v148_v63  ;;  %v149_v54 = vmul.f32 %v2356_v2, %v125_v62 }
  0xb3   :  { %v136_v5 = vadd.f32 1e-12, %v120_v3  ;;  %v121_v6 = vmax.f32 %v113_v4, 0.0 }
  0xb4   :  { %v2630_v8 = vadd.f32 %v2607_v31, %v160_v7  ;;  %v161_v10 = vmul.f32 %v2604_v24, %v149_v54 }
  0xb5   :  { %2361 = vrsqrt.f32 %v136_v5  ;;  %v137_v13 = vadd.f32 1e-12, %v121_v6 }
  0xb6   :  { %2063 = vmatprep.mubr.msk.f32.mxu0 %vm24_vm0, %v2630_v8  ;;  %v2638_v58 = vadd.f32 %v2607_v31, %v161_v10 }
  0xb7   :  { %v2358_v14 = vpop.eup %2357  ;;  %2363 = vrsqrt.f32 %v137_v13 }
  0xb8   :  { %2064 = vmatmul.mubr.msk.f32.gmra.mrb[2].mxu0 %vm24_vm0, %v2638_v58  ;;  %v150_v18 = vmul.f32 %v2358_v14, %v126_v9 }
  0xb9   :  { %v2360_v19 = vpop.eup %2359 }
  0xba   :  { %v162_v20 = vmul.f32 %v2604_v24, %v150_v18  ;;  %v151_v22 = vmul.f32 %v2360_v19, %v127_v16  ;;  %v486_v16 = vadd.s32 8, %v2585_v60  ;;  %v2719_v18 = vand.u32 127, %v154_v51 }
  0xbb   :  { %v488_v19 = vadd.s32 24, %v2585_v60  ;;  %v489_v51 = vadd.s32 32, %v2585_v60 }
  0xbc   :  { %v2646_v15 = vadd.f32 %v2607_v31, %v162_v20  ;;  %v163_v11 = vmul.f32 %v2604_v24, %v151_v22  ;;  %v494_v20 = vcvt.s32.f32 %v486_v16  ;;  %v503_v22 = vcvt.s32.f32 %v2719_v18 }
  0xbe   :  { %2066 = vmatprep.mubr.msk.f32.mxu0 %vm24_vm0, %v2646_v15  ;;  %v2653_v17 = vadd.f32 %v2607_v31, %v163_v11  ;;  %v493_v11 = vcvt.s32.f32 %v2585_v60 }
  0xbf   :  { %v2362_v21 = vpop.eup %2361 }
  0xc0   :  { %2067 = vmatmul.mubr.msk.f32.gmra.mrb[4].mxu0 %vm24_vm0, %v2653_v17  ;;  %v152_v28 = vmul.f32 %v2362_v21, %v128_v26  ;;  %v487_v26 = vadd.s32 16, %v2585_v60  ;;  %v496_v21 = vcvt.s32.f32 %v488_v19 }
  0xc1   :  { %v2364_v29 = vpop.eup %2363 }
  0xc2   :  { %v164_v30 = vmul.f32 %v2604_v24, %v152_v28  ;;  %v153_v32 = vmul.f32 %v2364_v29, %v129_v27  ;;  %v505_v27 = vmul.f32 0.125, %v494_v20  ;;  %v520_v28 = vmul.f32 0.125, %v503_v22 }
  0xc3   :  { %v490_v29 = vadd.s32 40, %v2585_v60 }
  0xc4   :  { %v2660_v0 = vadd.f32 %v2607_v31, %v164_v30  ;;  %v165_v23 = vmul.f32 %v2604_v24, %v153_v32  ;;  %v504_v30 = vmul.f32 0.125, %v493_v11  ;;  %v495_v32 = vcvt.s32.f32 %v487_v26 }
  0xc6   :  { %2069 = vmatprep.mubr.msk.f32.mxu0 %vm24_vm0, %v2660_v0  ;;  %v2666_v33 = vadd.f32 %v2607_v31, %v165_v23  ;;  %v507_v23 = vmul.f32 0.125, %v496_v21 }
  0xc8   :  { %2070 = vmatmul.mubr.msk.f32.gmra.mrb[6].mxu0 %vm24_vm0, %v2666_v33 }
 0x183   :  { %v2062_v35 = vpop.f32.mrb[0].mxu0 }
 0x184   :  { %v282_v36 = vadd.f32 %v2062_v35, %v185_v34  ;;  %v276_v37 = vpop.f32.mrb[1].mxu0  ;;  %v521_v35 = vfloor.f32 %v520_v28 }
 0x185   :  { %v277_v38 = vadd.f32 %v276_v37, %v185_v34  ;;  %v492_v37 = vadd.s32 56, %v2585_v60 }
 0x187   :  { %2088 = vmatprep.mubr.msk.f32.mxu1 %vm24_vm0, %v277_v38  ;;  %v2676_v24 = vpack.i.bf16 %v282_v36, %v277_v38  ;;  %v512_v38 = vfloor.f32 %v504_v30 }
 0x189   :  { %2309 = vrot.lane.b32.xlu0 %v2676_v24, %s2456_s10  ;;  %vm522_vm4 = vcmp.eq.f32.partialorder %v512_v38, %v521_v35 }
 0x18b   :  { %v2065_v31 = vpop.f32.mrb[2].mxu0 }
 0x18c   :  { %v292_v39 = vadd.f32 %v2065_v31, %v185_v34  ;;  %v286_v40 = vpop.f32.mrb[3].mxu0  ;;  %v506_v31 = vmul.f32 0.125, %v495_v32 }
 0x18d   :  { %v287_v41 = vadd.f32 %v286_v40, %v185_v34  ;;  %v497_v40 = vcvt.s32.f32 %v489_v51 }
 0x18f   :  { %v2679_v43 = vpack.i.bf16 %v292_v39, %v287_v41 }
 0x191   :  { %2314 = vrot.lane.b32.xlu1 %v2679_v43, %s2456_s10 }
 0x193   :  { %v2068_v44 = vpop.f32.mrb[4].mxu0 }
 0x194   :  { %v302_v46 = vadd.f32 %v2068_v44, %v185_v34  ;;  %v296_v47 = vpop.f32.mrb[5].mxu0 }
 0x195   :  { %v297_v48 = vadd.f32 %v296_v47, %v185_v34  ;;  %v500_v47 = vcvt.s32.f32 %v492_v37 }
 0x197   :  { %v2682_v1 = vpack.i.bf16 %v302_v46, %v297_v48 }
 0x199   :  { %2319 = vrot.lane.b32.xlu1 %v2682_v1, %s2456_s10 }
 0x19b   :  { %v2071_v45 = vpop.f32.mrb[6].mxu0 }
 0x19c   :  { %v312_v49 = vadd.f32 %v2071_v45, %v185_v34  ;;  %v306_v50 = vpop.f32.mrb[7].mxu0 }
 0x19d   :  { %v307_v52 = vadd.f32 %v306_v50, %v185_v34  ;;  %v513_v34 = vfloor.f32 %v505_v27  ;;  %v514_v50 = vfloor.f32 %v506_v31 }
 0x19f   :  { %v2685_v53 = vpack.i.bf16 %v312_v49, %v307_v52  ;;  %vm523_vm2 = vcmp.eq.f32.partialorder %v513_v34, %v521_v35  ;;  %vm524_vm6 = vcmp.eq.f32.partialorder %v514_v50, %v521_v35 }
 0x1a1   :  { %2324 = vrot.lane.b32.xlu1 %v2685_v53, %s2456_s10 }
 0x1fb   :  { %v2310_v56 = vpop.permute.xlu0 %2309 }
 0x1fc   :  { %v2312_v57 = vunpack.i.h.bf16 %v2310_v56  ;;  %v2311_v59 = vunpack.i.l.bf16 %v2310_v56  ;;  %v508_v56 = vmul.f32 0.125, %v497_v40 }
 0x1fe   :  { %v2220_v62 = vpack.c.bf16 %v2312_v57, %v2311_v59 }
 0x200   :  { %2222 = vmatprep.subr.msk.bf16.mxu1 %vm2690_vm1, %v2220_v62 }
 0x201   :  { %2225 = vmatpush3.bf16.xpose.msk.msra.mxu1 %vm2690_vm1, %v2220_v62 }
 0x203   :  { %v2315_v63 = vpop.permute.xlu1 %2314 }
 0x204   :  { %v2317_v2 = vunpack.i.h.bf16 %v2315_v63  ;;  %v2316_v3 = vunpack.i.l.bf16 %v2315_v63 }
 0x206   :  { %v2226_v4 = vpack.c.bf16 %v2317_v2, %v2316_v3  ;;  %v511_v2 = vmul.f32 0.125, %v500_v47 }
 0x208   :  { %2228 = vmatprep.subr.msk.bf16.mxu1 %vm2690_vm1, %v2226_v4 }
 0x209   :  { %2231 = vmatpush3.bf16.xpose.msk.msra.mxu1 %vm2690_vm1, %v2226_v4 }
 0x20b   :  { %v2320_v7 = vpop.permute.xlu1 %2319 }
 0x20c   :  { %v2322_v54 = vunpack.i.h.bf16 %v2320_v7  ;;  %v2321_v5 = vunpack.i.l.bf16 %v2320_v7 }
 0x20e   :  { %v2232_v6 = vpack.c.bf16 %v2322_v54, %v2321_v5 }
 0x210   :  { %2234 = vmatprep.subr.msk.bf16.mxu1 %vm2690_vm1, %v2232_v6 }
 0x211   :  { %2237 = vmatpush3.bf16.xpose.msk.msra.mxu1 %vm2690_vm1, %v2232_v6  ;;  %v516_v6 = vfloor.f32 %v508_v56 }
 0x213   :  { %v2325_v10 = vpop.permute.xlu1 %2324  ;;  %vm526_vm8 = vcmp.eq.f32.partialorder %v516_v6, %v521_v35 }
 0x214   :  { %v2327_v13 = vunpack.i.h.bf16 %v2325_v10  ;;  %v2326_v9 = vunpack.i.l.bf16 %v2325_v10 }
 0x216   :  { %v2238_v14 = vpack.c.bf16 %v2327_v13, %v2326_v9 }
 0x218   :  { %2240 = vmatprep.subr.msk.bf16.mxu1 %vm2690_vm1, %v2238_v14 }
 0x219   :  { %2243 = vmatpush3.bf16.xpose.msk.msra.mxu1 %vm2690_vm1, %v2238_v14  ;;  %v519_v14 = vfloor.f32 %v511_v2  ;;  %vm1616_vm1 = vcmask 1045509  }
 0x21b   :  { %vm529_vm9 = vcmp.eq.f32.partialorder %v519_v14, %v521_v35 }
 0x220   :  { %2089 = vmatmul.mubr.msk.f32.vlgmr.msra.gmra.mrb[0].mxu1 %vm24_vm0, %v282_v36  ;;  %v498_v36 = vcvt.s32.f32 %v490_v29 }
 0x221   :  { %2091 = vmatprep.mubr.msk.f32.mxu1 %vm24_vm0, %v287_v41  ;;  %v491_v41 = vadd.s32 48, %v2585_v60 }
 0x223   :  { %v499_v57 = vcvt.s32.f32 %v491_v41 }
 0x224   :  { %2092 = vmatmul.mubr.msk.f32.gmra.mrb[2].mxu1 %vm24_vm0, %v292_v39  ;;  %v515_v39 = vfloor.f32 %v507_v23 }
 0x225   :  { %2094 = vmatprep.mubr.msk.f32.mxu1 %vm24_vm0, %v297_v48  ;;  %v510_v10 = vmul.f32 0.125, %v499_v57 }
 0x226   :  { %vm525_vm5 = vcmp.eq.f32.partialorder %v515_v39, %v521_v35 }
 0x227   :  { %v518_v26 = vfloor.f32 %v510_v10 }
 0x228   :  { %2095 = vmatmul.mubr.msk.f32.gmra.mrb[4].mxu1 %vm24_vm0, %v302_v46  ;;  %v509_v46 = vmul.f32 0.125, %v498_v36 }
 0x229   :  { %2097 = vmatprep.mubr.msk.f32.mxu1 %vm24_vm0, %v307_v52  ;;  %vm528_vm10 = vcmp.eq.f32.partialorder %v518_v26, %v521_v35 }
 0x22a   :  { %v517_v63 = vfloor.f32 %v509_v46 }
 0x22c   :  { %2098 = vmatmul.mubr.msk.f32.gmra.mrb[6].mxu1 %vm24_vm0, %v312_v49  ;;  %vm527_vm7 = vcmp.eq.f32.partialorder %v517_v63, %v521_v35 }
 0x2f3   :  { %v2090_v44 = vpop.f32.mrb[0].mxu1 }
 0x2f4   :  { %v477_v48 = vmul.f32 0.17677669, %v2090_v44  ;;  %v437_v45 = vpop.f32.mrb[1].mxu1 }
 0x2f5   :  { %v476_v49 = vmul.f32 0.17677669, %v437_v45 }
 0x2f6   :  { %v531_v52 = vsel %vm523_vm2, %v477_v48, -inf  ;;  %vm1619_vm2 = vcmask 1046534  }
 0x2f7   :  { %v2093_v59 = vpop.f32.mrb[2].mxu1  ;;  %v542_v61 = vsel %vm538_vm3, %v531_v52, -inf  ;;  %v530_v62 = vsel %vm522_vm4, %v476_v49, -inf }
 0x2f8   :  { %v479_v3 = vmul.f32 0.17677669, %v2093_v59  ;;  %543 = vmax.xlane.f32.xlu1 %v542_v61  ;;  %v447_v4 = vpop.f32.mrb[3].mxu1  ;;  %v539_v7 = vsel %vm538_vm3, %v530_v62, -inf }
 0x2f9   :  { %v478_v54 = vmul.f32 0.17677669, %v447_v4  ;;  %540 = vmax.xlane.f32.xlu0 %v539_v7 }
 0x2fa   :  { %v533_v5 = vsel %vm525_vm5, %v479_v3, -inf  ;;  %vm1815_vm5 = vcmask 57376  }
 0x2fb   :  { %v2096_v13 = vpop.f32.mrb[4].mxu1  ;;  %v548_v9 = vsel %vm538_vm3, %v533_v5, -inf  ;;  %v532_v22 = vsel %vm524_vm6, %v478_v54, -inf }
 0x2fc   :  { %v481_v16 = vmul.f32 0.17677669, %v2096_v13  ;;  %v457_v19 = vpop.f32.mrb[5].mxu1  ;;  %v545_v30 = vsel %vm538_vm3, %v532_v22, -inf }
 0x2fd   :  { %v480_v20 = vmul.f32 0.17677669, %v457_v19  ;;  %549 = vmax.xlane.f32.xlu0 %v548_v9 }
 0x2fe   :  { %v535_v11 = vsel %vm527_vm7, %v481_v16, -inf }
 0x2ff   :  { %v2099_v21 = vpop.f32.mrb[6].mxu1  ;;  %v554_v27 = vsel %vm538_vm3, %v535_v11, -inf  ;;  %v534_v23 = vsel %vm526_vm8, %v480_v20, -inf }
 0x300   :  { %v483_v28 = vmul.f32 0.17677669, %v2099_v21  ;;  %555 = vmax.xlane.f32.xlu1 %v554_v27  ;;  %v467_v29 = vpop.f32.mrb[7].mxu1  ;;  %v551_v36 = vsel %vm538_vm3, %v534_v23, -inf }
 0x301   :  { %v482_v32 = vmul.f32 0.17677669, %v467_v29  ;;  %546 = vmax.xlane.f32.xlu0 %v545_v30 }
 0x302   :  { %v537_v51 = vsel %vm529_vm9, %v483_v28, -inf }
 0x303   :  { %v560_v34 = vsel %vm538_vm3, %v537_v51, -inf  ;;  %v536_v37 = vsel %vm528_vm10, %v482_v32, -inf  ;;  %vm1885_vm10 = vcmask 64512  }
 0x304   :  { %561 = vmax.xlane.f32.xlu1 %v560_v34  ;;  %v557_v38 = vsel %vm538_vm3, %v536_v37, -inf }
 0x305   :  { %552 = vmax.xlane.f32.xlu0 %v551_v36 }
 0x309   :  { %558 = vmax.xlane.f32.xlu0 %v557_v38 }
 0x315   :  { %2334 = vrot.lane.b32.xlu1 %v2679_v43, %s2457_s11 }
 0x31f   :  { %2329 = vrot.lane.b32.xlu0 %v2676_v24, %s2457_s11 }
 0x385   :  { %v544_v31 = vpop.xlane.xlu1 %543 }
 0x386   :  { %v564_v39 = vsub.f32 %v531_v52, %v544_v31  ;;  %v541_v35 = vpop.xlane.xlu0 %540 }
 0x387   :  { %v563_v40 = vsub.f32 %v530_v62, %v541_v35 }
 0x388   :  { %v573_v41 = vmul.f32 1.442695, %v564_v39 }
 0x389   :  { %v571_v44 = vmul.f32 1.442695, %v563_v40 }
 0x38a   :  { %2365 = vpow2.f32 %v573_v41  ;;  %v550_v46 = vpop.xlane.xlu0 %549 }
 0x38b   :  { %2367 = vpow2.f32 %v571_v44  ;;  %v566_v47 = vsub.f32 %v533_v5, %v550_v46 }
 0x38d   :  { %v577_v48 = vmul.f32 1.442695, %v566_v47  ;;  %v556_v45 = vpop.xlane.xlu1 %555 }
 0x38e   :  { %v568_v49 = vsub.f32 %v535_v11, %v556_v45  ;;  %v547_v50 = vpop.xlane.xlu0 %546 }
 0x38f   :  { %2369 = vpow2.f32 %v577_v48  ;;  %v565_v56 = vsub.f32 %v532_v22, %v547_v50  ;;  %v780_v50 = vld [vmem:[%s3204_s1 + $0x20] sm:$0xff] }
 0x390   :  { %v581_v43 = vmul.f32 1.442695, %v568_v49 }
 0x391   :  { %v575_v57 = vmul.f32 1.442695, %v565_v56  ;;  %v562_v59 = vpop.xlane.xlu1 %561  ;;  %v781_v56 = vld [vmem:[%s3204_s1 + $0x28] sm:$0xff] }
 0x392   :  { %2371 = vpow2.f32 %v581_v43  ;;  %v570_v24 = vsub.f32 %v537_v51, %v562_v59  ;;  %v553_v52 = vpop.xlane.xlu0 %552 }
 0x393   :  { %2373 = vpow2.f32 %v575_v57  ;;  %v567_v61 = vsub.f32 %v534_v23, %v553_v52 }
 0x394   :  { %v2741_v62 = vpop.eup %2365  ;;  %v585_v63 = vmul.f32 1.442695, %v570_v24  ;;  %v2260_v24 = vpack.c.bf16 %v781_v56, %v780_v50 }
 0x395   :  { %v2368_v2 = vpop.eup %2367  ;;  %v579_v3 = vmul.f32 1.442695, %v567_v61  ;;  %v590_v4 = vsel %vm538_vm3, %v2741_v62, 0.0  ;;  %v2335_v10 = vpop.permute.xlu1 %2334  ;;  %v782_v61 = vld [vmem:[%s3204_s1 + $0x30] sm:$0xff] }
 0x396   :  { %2375 = vpow2.f32 %v585_v63  ;;  %591 = vadd.xlane.f32.xlu1 %v590_v4  ;;  %v559_v7 = vpop.xlane.xlu0 %558  ;;  %v587_v54 = vsel %vm538_vm3, %v2368_v2, 0.0  ;;  %v2337_v22 = vunpack.i.h.bf16 %v2335_v10  ;;  %v2336_v11 = vunpack.i.l.bf16 %v2335_v10  ;;  %v783_v63 = vld [vmem:[%s3204_s1 + $0x38] sm:$0xff] }
 0x397   :  { %2377 = vpow2.f32 %v579_v3  ;;  %v569_v5 = vsub.f32 %v536_v37, %v559_v7  ;;  %588 = vadd.xlane.f32.xlu0 %v587_v54  ;;  %v2264_v4 = vpack.c.bf16 %v783_v63, %v782_v61 }
 0x398   :  { %v2248_v30 = vpack.c.bf16 %v2337_v22, %v2336_v11 }
 0x399   :  { %v2746_v6 = vpop.eup %2369  ;;  %v583_v13 = vmul.f32 1.442695, %v569_v5 }
 0x39a   :  { %v2330_v9 = vpop.permute.xlu0 %2329  ;;  %v596_v14 = vsel %vm538_vm3, %v2746_v6, 0.0 }
 0x39b   :  { %2379 = vpow2.f32 %v583_v13  ;;  %v2332_v16 = vunpack.i.h.bf16 %v2330_v9  ;;  %v2331_v19 = vunpack.i.l.bf16 %v2330_v9  ;;  %597 = vadd.xlane.f32.xlu1 %v596_v14 }
 0x39c   :  { %v2750_v20 = vpop.eup %2371 }
 0x39d   :  { %v2752_v26 = vpop.eup %2373  ;;  %v2244_v21 = vpack.c.bf16 %v2332_v16, %v2331_v19  ;;  %v602_v27 = vsel %vm538_vm3, %v2750_v20, 0.0 }
 0x39e   :  { %v593_v28 = vsel %vm538_vm3, %v2752_v26, 0.0 }
 0x39f   :  { %603 = vadd.xlane.f32.xlu1 %v602_v27  ;;  %594 = vadd.xlane.f32.xlu0 %v593_v28 }
 0x3a0   :  { %v2758_v29 = vpop.eup %2375  ;;  %2245 = vmatprep.subr.bf16.mxu0 %v2244_v21 }
 0x3a1   :  { %v2760_v32 = vpop.eup %2377  ;;  %2247 = vmatpush3.bf16.msra.mxu0 %v2244_v21  ;;  %v608_v23 = vsel %vm538_vm3, %v2758_v29, 0.0 }
 0x3a2   :  { %2249 = vmatprep.subr.bf16.mxu0 %v2248_v30  ;;  %v599_v51 = vsel %vm538_vm3, %v2760_v32, 0.0 }
 0x3a3   :  { %609 = vadd.xlane.f32.xlu1 %v608_v23  ;;  %600 = vadd.xlane.f32.xlu0 %v599_v51 }
 0x3a5   :  { %v2766_v34 = vpop.eup %2379  ;;  %2251 = vmatpush3.bf16.msra.mxu0 %v2248_v30  ;;  %v786_v30 = vsub.s32 1, %v2585_v60 }
 0x3a6   :  { %v605_v36 = vsel %vm538_vm3, %v2766_v34, 0.0 }
 0x3a7   :  { %606 = vadd.xlane.f32.xlu1 %v605_v36 }
 0x3b8   :  { %2344 = vrot.lane.b32.xlu1 %v2685_v53, %s2457_s11 }
 0x3b9   :  { %2339 = vrot.lane.b32.xlu0 %v2682_v1, %s2457_s11 }
 0x423   :  { %v592_v37 = vpop.xlane.xlu1 %591 }
 0x424   :  { %v589_v38 = vpop.xlane.xlu0 %588 }
 0x425   :  { %2381 = vrcp.f32 %v589_v38 }
 0x426   :  { %2383 = vrcp.f32 %v592_v37 }
 0x428   :  { %v598_v31 = vpop.xlane.xlu1 %597 }
 0x42c   :  { %v604_v39 = vpop.xlane.xlu1 %603  ;;  %v595_v35 = vpop.xlane.xlu0 %594 }
 0x42d   :  { %2385 = vrcp.f32 %v595_v35 }
 0x42e   :  { %2387 = vrcp.f32 %v598_v31 }
 0x42f   :  { %v2382_v40 = vpop.eup %2381 }
 0x430   :  { %v610_v41 = vpop.xlane.xlu1 %609  ;;  %v601_v44 = vpop.xlane.xlu0 %600  ;;  %v612_v46 = vmul.f32 %v2382_v40, %v2368_v2 }
 0x431   :  { %2389 = vrcp.f32 %v601_v44  ;;  %v2384_v52 = vpop.eup %2383 }
 0x432   :  { %2116 = vmatprep.mubr.msk.f32.mxu0 %vm538_vm3, %v612_v46  ;;  %2391 = vrcp.f32 %v604_v39  ;;  %v614_v3 = vmul.f32 %v2384_v52, %v2741_v62 }
 0x434   :  { %v607_v47 = vpop.xlane.xlu1 %606  ;;  %v2340_v48 = vpop.permute.xlu0 %2339 }
 0x435   :  { %v2342_v53 = vunpack.i.h.bf16 %v2340_v48  ;;  %v2341_v45 = vunpack.i.l.bf16 %v2340_v48  ;;  %2393 = vrcp.f32 %v607_v47 }
 0x436   :  { %2395 = vrcp.f32 %v610_v41 }
 0x437   :  { %v2252_v1 = vpack.c.bf16 %v2342_v53, %v2341_v45  ;;  %v2386_v2 = vpop.eup %2385 }
 0x438   :  { %v2345_v49 = vpop.permute.xlu1 %2344  ;;  %v2388_v7 = vpop.eup %2387  ;;  %v616_v54 = vmul.f32 %v2386_v2, %v2752_v26 }
 0x439   :  { %v2347_v43 = vunpack.i.h.bf16 %v2345_v49  ;;  %v2346_v57 = vunpack.i.l.bf16 %v2345_v49  ;;  %2253 = vmatprep.subr.bf16.mxu0 %v2252_v1  ;;  %v618_v10 = vmul.f32 %v2388_v7, %v2746_v6 }
 0x43a   :  { %2255 = vmatpush3.bf16.msra.mxu0 %v2252_v1 }
 0x43b   :  { %v2256_v59 = vpack.c.bf16 %v2347_v43, %v2346_v57  ;;  %v2390_v5 = vpop.eup %2389 }
 0x43c   :  { %v2392_v13 = vpop.eup %2391  ;;  %v620_v9 = vmul.f32 %v2390_v5, %v2760_v32  ;;  %v787_v32 = vrot.slane %v2595_v12, %v786_v30 }
 0x43d   :  { %2257 = vmatprep.subr.bf16.mxu0 %v2256_v59  ;;  %v622_v62 = vmul.f32 %v2392_v13, %v2750_v20 }
 0x43e   :  { %2259 = vmatpush3.bf16.msra.mxu0 %v2256_v59 }
 0x43f   :  { %2261 = vmatprep.subr.bf16.mxu0 %v2260_v24  ;;  %v2394_v14 = vpop.eup %2393 }
 0x440   :  { %v2396_v16 = vpop.eup %2395  ;;  %v624_v19 = vmul.f32 %v2394_v14, %v2766_v34 }
 0x441   :  { %2117 = vmatmul.mubr.msk.f32.vlgmr.msra.gmra.mrb[8].mxu0 %vm538_vm3, %v614_v3  ;;  %v626_v6 = vmul.f32 %v2396_v16, %v2758_v29 }
 0x442   :  { %2119 = vmatprep.mubr.msk.f32.mxu0 %vm538_vm3, %v616_v54  ;;  %2263 = vmatpush3.bf16.msra.mxu0 %v2260_v24 }
 0x443   :  { %2265 = vmatprep.subr.bf16.mxu0 %v2264_v4 }
 0x445   :  { %2120 = vmatmul.mubr.msk.f32.gmra.mrb[10].mxu0 %vm538_vm3, %v618_v10 }
 0x446   :  { %2122 = vmatprep.mubr.msk.f32.mxu0 %vm538_vm3, %v620_v9  ;;  %2267 = vmatpush3.bf16.msra.mxu0 %v2264_v4 }
 0x449   :  { %2123 = vmatmul.mubr.msk.f32.gmra.mrb[12].mxu0 %vm538_vm3, %v622_v62 }
 0x44a   :  { %2125 = vmatprep.mubr.msk.f32.mxu0 %vm538_vm3, %v624_v19  ;;  %v1077_v19 = vld [vmem:[%s3204_s1 + $0x40] sm:$0xff] }
 0x44d   :  { %2126 = vmatmul.mubr.msk.f32.gmra.mrb[14].mxu0 %vm538_vm3, %v626_v6 }
 0x514   :  { %v2118_v22 = vpop.f32.mrb[8].mxu0 }
 0x515   :  { %v741_v11 = vpop.f32.mrb[9].mxu0 }
 0x516   :  { %2136 = vmatprep.mubr.msk.f32.mxu0 %vm24_vm0, %v741_v11  ;;  %v1080_v11 = vld [vmem:[%s3204_s1 + $0x58] sm:$0xff] }
 0x517   :  { %2137 = vmatmul.mubr.msk.f32.vlgmr.msra.gmra.mrb[16].mxu0 %vm24_vm0, %v2118_v22  ;;  %v1079_v22 = vld [vmem:[%s3204_s1 + $0x50] sm:$0xff] }
 0x518   :  { %v2121_v26 = vpop.f32.mrb[10].mxu0 }
 0x519   :  { %v751_v21 = vpop.f32.mrb[11].mxu0 }
 0x51a   :  { %2139 = vmatprep.mubr.msk.f32.mxu0 %vm24_vm0, %v751_v21 }
 0x51b   :  { %2140 = vmatmul.mubr.msk.f32.gmra.mrb[18].mxu0 %vm24_vm0, %v2121_v26  ;;  %v2272_v26 = vpack.c.bf16 %v1080_v11, %v1079_v22 }
 0x51c   :  { %v2124_v20 = vpop.f32.mrb[12].mxu0 }
 0x51d   :  { %v761_v27 = vpop.f32.mrb[13].mxu0 }
 0x51e   :  { %2142 = vmatprep.mubr.msk.f32.mxu0 %vm24_vm0, %v761_v27 }
 0x51f   :  { %2143 = vmatmul.mubr.msk.f32.gmra.mrb[20].mxu0 %vm24_vm0, %v2124_v20 }
 0x520   :  { %v2127_v28 = vpop.f32.mrb[14].mxu0 }
 0x521   :  { %v771_v29 = vpop.f32.mrb[15].mxu0 }
 0x522   :  { %2145 = vmatprep.mubr.msk.f32.mxu0 %vm24_vm0, %v771_v29 }
 0x523   :  { %2146 = vmatmul.mubr.msk.f32.gmra.mrb[22].mxu0 %vm24_vm0, %v2127_v28 }
 0x5ea   :  { %v2138_v23 = vpop.f32.mrb[16].mxu0 }
 0x5eb   :  { %v884_v51 = vadd.f32 %v2138_v23, %v787_v32  ;;  %v878_v34 = vpop.f32.mrb[17].mxu0 }
 0x5ec   :  { %v879_v36 = vadd.f32 %v878_v34, %v787_v32 }
 0x5ed   :  { %v2814_v37 = vadd.f32 %v884_v51, %v2622_v55 }
 0x5ee   :  { %v2817_v38 = vadd.f32 %v879_v36, %v2614_v42  ;;  %v2141_v31 = vpop.f32.mrb[18].mxu0 }
 0x5ef   :  { %v894_v39 = vadd.f32 %v2141_v31, %v787_v32  ;;  %v888_v35 = vpop.f32.mrb[19].mxu0  ;;  %v928_v40 = vsel %vm24_vm0, %v2814_v37, 0.0  ;;  %v958_v41 = vmul.f32 %v2814_v37, %v2814_v37 }
 0x5f0   :  { %929 = vadd.xlane.f32.xlu1 %v928_v40  ;;  %v925_v12 = vsel %vm24_vm0, %v2817_v38, 0.0  ;;  %v889_v53 = vadd.f32 %v888_v35, %v787_v32  ;;  %v957_v1 = vmul.f32 %v2817_v38, %v2817_v38 }
 0x5f1   :  { %v2826_v44 = vadd.f32 %v894_v39, %v2638_v58  ;;  %926 = vadd.xlane.f32.xlu0 %v925_v12  ;;  %v968_v45 = vsel %vm24_vm0, %v958_v41, 0.0 }
 0x5f2   :  { %v2144_v55 = vpop.f32.mrb[20].mxu0  ;;  %v2840_v43 = vadd.f32 %v889_v53, %v2630_v8  ;;  %v965_v57 = vsel %vm24_vm0, %v957_v1, 0.0 }
 0x5f3   :  { %v904_v42 = vadd.f32 %v2144_v55, %v787_v32  ;;  %v898_v46 = vpop.f32.mrb[21].mxu0  ;;  %v934_v47 = vsel %vm24_vm0, %v2826_v44, 0.0  ;;  %v960_v48 = vmul.f32 %v2826_v44, %v2826_v44 }
 0x5f4   :  { %935 = vadd.xlane.f32.xlu1 %v934_v47  ;;  %v899_v61 = vadd.f32 %v898_v46, %v787_v32  ;;  %v959_v8 = vmul.f32 %v2840_v43, %v2840_v43 }
 0x5f5   :  { %969 = vadd.xlane.f32.xlu0 %v968_v45  ;;  %v2836_v49 = vadd.f32 %v904_v42, %v2653_v17  ;;  %v974_v56 = vsel %vm24_vm0, %v960_v48, 0.0  ;;  %v931_v17 = vsel %vm24_vm0, %v2840_v43, 0.0 }
 0x5f6   :  { %v2147_v58 = vpop.f32.mrb[22].mxu0  ;;  %v2856_v3 = vadd.f32 %v899_v61, %v2646_v15  ;;  %v971_v4 = vsel %vm24_vm0, %v959_v8, 0.0 }
 0x5f7   :  { %v908_v50 = vpop.f32.mrb[23].mxu0  ;;  %v914_v59 = vadd.f32 %v2147_v58, %v787_v32  ;;  %v940_v24 = vsel %vm24_vm0, %v2836_v49, 0.0  ;;  %v962_v52 = vmul.f32 %v2836_v49, %v2836_v49 }
 0x5f8   :  { %975 = vadd.xlane.f32.xlu1 %v974_v56  ;;  %v909_v5 = vadd.f32 %v908_v50, %v787_v32  ;;  %v961_v10 = vmul.f32 %v2856_v3, %v2856_v3 }
 0x5f9   :  { %966 = vadd.xlane.f32.xlu0 %v965_v57  ;;  %v2852_v63 = vadd.f32 %v914_v59, %v2666_v33  ;;  %v980_v2 = vsel %vm24_vm0, %v962_v52, 0.0  ;;  %v937_v33 = vsel %vm24_vm0, %v2856_v3, 0.0 }
 0x5fa   :  { %v2869_v13 = vadd.f32 %v909_v5, %v2660_v0  ;;  %v977_v9 = vsel %vm24_vm0, %v961_v10, 0.0  ;;  %v1078_v0 = vld [vmem:[%s3204_s1 + $0x48] sm:$0xff] }
 0x5fb   :  { %v946_v7 = vsel %vm24_vm0, %v2852_v63, 0.0  ;;  %v964_v54 = vmul.f32 %v2852_v63, %v2852_v63  ;;  %v2268_v6 = vpack.c.bf16 %v1078_v0, %v1077_v19 }
 0x5fc   :  { %941 = vadd.xlane.f32.xlu1 %v940_v24  ;;  %v943_v14 = vsel %vm24_vm0, %v2869_v13, 0.0  ;;  %v963_v62 = vmul.f32 %v2869_v13, %v2869_v13 }
 0x5fd   :  { %932 = vadd.xlane.f32.xlu0 %v931_v17  ;;  %v986_v15 = vsel %vm24_vm0, %v964_v54, 0.0  ;;  %2269 = vmatprep.subr.bf16.mxu1 %v2268_v6 }
 0x5fe   :  { %v983_v16 = vsel %vm24_vm0, %v963_v62, 0.0  ;;  %2271 = vmatpush3.bf16.msra.mxu1 %v2268_v6 }
 0x5ff   :  { %2273 = vmatprep.subr.bf16.mxu1 %v2272_v26 }
 0x600   :  { %981 = vadd.xlane.f32.xlu1 %v980_v2 }
 0x601   :  { %972 = vadd.xlane.f32.xlu0 %v971_v4  ;;  %v1055_v4 = vsub.s32 6, %v2585_v60 }
 0x602   :  { %2275 = vmatpush3.bf16.msra.mxu1 %v2272_v26 }
 0x604   :  { %947 = vadd.xlane.f32.xlu1 %v946_v7 }
 0x605   :  { %938 = vadd.xlane.f32.xlu0 %v937_v33 }
 0x608   :  { %987 = vadd.xlane.f32.xlu1 %v986_v15 }
 0x609   :  { %978 = vadd.xlane.f32.xlu0 %v977_v9 }
 0x60d   :  { %944 = vadd.xlane.f32.xlu0 %v943_v14 }
 0x611   :  { %984 = vadd.xlane.f32.xlu0 %v983_v16  ;;  %v2908_v16 = vld [vmem:[%s3204_s1 + $0xc0] sm:$0xff] }
 0x612   :  { %v2911_v19 = vrot.slane %v2908_v16, %v1055_v4 }
 0x67d   :  { %v930_v21 = vpop.xlane.xlu1 %929 }
 0x67e   :  { %v927_v20 = vpop.xlane.xlu0 %926  ;;  %v950_v27 = vmul.f32 0.03125, %v930_v21 }
 0x67f   :  { %v949_v51 = vmul.f32 0.03125, %v927_v20  ;;  %v1067_v20 = vsub.s32 7, %v2585_v60 }
 0x680   :  { %v998_v23 = vmul.f32 %v950_v27, %v950_v27  ;;  %v1022_v62 = vsub.f32 %v2814_v37, %v950_v27 }
 0x681   :  { %v936_v28 = vpop.xlane.xlu1 %935  ;;  %v997_v12 = vmul.f32 %v949_v51, %v949_v51 }
 0x682   :  { %v2889_v29 = vmul.f32 0.03125, %v936_v28  ;;  %v970_v32 = vpop.xlane.xlu0 %969 }
 0x683   :  { %v990_v34 = vmul.f32 0.03125, %v970_v32  ;;  %v1021_v32 = vsub.f32 %v2817_v38, %v949_v51 }
 0x684   :  { %v1000_v39 = vmul.f32 %v2889_v29, %v2889_v29 }
 0x685   :  { %v1006_v36 = vsub.f32 %v990_v34, %v998_v23  ;;  %v976_v31 = vpop.xlane.xlu1 %975 }
 0x686   :  { %v992_v35 = vmul.f32 0.03125, %v976_v31  ;;  %v967_v40 = vpop.xlane.xlu0 %966 }
 0x687   :  { %v1014_v41 = vmax.f32 %v1006_v36, 0.0  ;;  %v989_v55 = vmul.f32 0.03125, %v967_v40 }
 0x688   :  { %v1008_v42 = vsub.f32 %v992_v35, %v1000_v39 }
 0x689   :  { %v1030_v46 = vadd.f32 1e-12, %v1014_v41  ;;  %v1005_v47 = vsub.f32 %v989_v55, %v997_v12  ;;  %v942_v48 = vpop.xlane.xlu1 %941 }
 0x68a   :  { %v1016_v53 = vmax.f32 %v1008_v42, 0.0  ;;  %v2893_v45 = vmul.f32 0.03125, %v942_v48  ;;  %v933_v1 = vpop.xlane.xlu0 %932  ;;  %v1068_v42 = vrot.slane %v2908_v16, %v1067_v20 }
 0x68b   :  { %2397 = vrsqrt.f32 %v1030_v46  ;;  %v1013_v58 = vmax.f32 %v1005_v47, 0.0  ;;  %v2895_v50 = vmul.f32 0.03125, %v933_v1  ;;  %v1024_v46 = vsub.f32 %v2826_v44, %v2889_v29 }
 0x68c   :  { %v1032_v56 = vadd.f32 1e-12, %v1016_v53  ;;  %v1002_v24 = vmul.f32 %v2893_v45, %v2893_v45 }
 0x68d   :  { %v1029_v57 = vadd.f32 1e-12, %v1013_v58  ;;  %v982_v59 = vpop.xlane.xlu1 %981  ;;  %v999_v17 = vmul.f32 %v2895_v50, %v2895_v50 }
 0x68e   :  { %v994_v52 = vmul.f32 0.03125, %v982_v59  ;;  %v973_v61 = vpop.xlane.xlu0 %972  ;;  %v1023_v59 = vsub.f32 %v2840_v43, %v2895_v50 }
 0x68f   :  { %2399 = vrsqrt.f32 %v1029_v57  ;;  %v991_v8 = vmul.f32 0.03125, %v973_v61 }
 0x690   :  { %v1010_v2 = vsub.f32 %v994_v52, %v1002_v24  ;;  %2401 = vrsqrt.f32 %v1032_v56 }
 0x691   :  { %v1007_v7 = vsub.f32 %v991_v8, %v999_v17  ;;  %v948_v54 = vpop.xlane.xlu1 %947 }
 0x692   :  { %v1018_v5 = vmax.f32 %v1010_v2, 0.0  ;;  %v2902_v33 = vmul.f32 0.03125, %v948_v54  ;;  %v939_v10 = vpop.xlane.xlu0 %938  ;;  %v1026_v2 = vsub.f32 %v2836_v49, %v2893_v45 }
 0x693   :  { %v1015_v15 = vmax.f32 %v1007_v7, 0.0  ;;  %v953_v9 = vmul.f32 0.03125, %v939_v10 }
 0x694   :  { %v1034_v22 = vadd.f32 1e-12, %v1018_v5  ;;  %v1004_v11 = vmul.f32 %v2902_v33, %v2902_v33 }
 0x695   :  { %v2398_v14 = vpop.eup %2397  ;;  %v1031_v0 = vadd.f32 1e-12, %v1015_v15  ;;  %v988_v6 = vpop.xlane.xlu1 %987  ;;  %v1001_v37 = vmul.f32 %v953_v9, %v953_v9  ;;  %v1025_v54 = vsub.f32 %v2856_v3, %v953_v9 }
 0x696   :  { %v996_v26 = vmul.f32 0.03125, %v988_v6  ;;  %v979_v21 = vpop.xlane.xlu0 %978  ;;  %v1046_v28 = vmul.f32 %v2398_v14, %v1022_v62  ;;  %v1028_v14 = vsub.f32 %v2852_v63, %v2902_v33 }
 0x697   :  { %2403 = vrsqrt.f32 %v1031_v0  ;;  %v993_v27 = vmul.f32 0.03125, %v979_v21  ;;  %v1287_v21 = vld [vmem:[%s3204_s1 + $0x68] sm:$0xff] }
 0x698   :  { %v1012_v23 = vsub.f32 %v996_v26, %v1004_v11  ;;  %2405 = vrsqrt.f32 %v1034_v22  ;;  %v1058_v12 = vmul.f32 %v2911_v19, %v1046_v28  ;;  %v1289_v28 = vld [vmem:[%s3204_s1 + $0x78] sm:$0xff] }
 0x699   :  { %v2400_v34 = vpop.eup %2399  ;;  %v1009_v36 = vsub.f32 %v993_v27, %v1001_v37  ;;  %v1290_v27 = vld [vmem:[%s3204_s1 + $0x80] sm:$0xff] }
 0x69a   :  { %v1020_v31 = vmax.f32 %v1012_v23, 0.0  ;;  %v945_v39 = vpop.xlane.xlu0 %944  ;;  %v1045_v35 = vmul.f32 %v2400_v34, %v1021_v32  ;;  %v2402_v40 = vpop.eup %2401  ;;  %v2924_v57 = vadd.f32 %v1068_v42, %v1058_v12  ;;  %v1291_v32 = vld [vmem:[%s3204_s1 + $0x88] sm:$0xff]  ;;  %v1292_v34 = vld [vmem:[%s3204_s1 + $0x90] sm:$0xff] }
 0x69b   :  { %v1017_v41 = vmax.f32 %v1009_v36, 0.0  ;;  %v955_v55 = vmul.f32 0.03125, %v945_v39  ;;  %v1048_v1 = vmul.f32 %v2402_v40, %v1024_v46  ;;  %v2284_v23 = vpack.c.bf16 %v1291_v32, %v1290_v27  ;;  %v1293_v36 = vld [vmem:[%s3204_s1 + $0x98] sm:$0xff] }
 0x69c   :  { %v1057_v47 = vmul.f32 %v2911_v19, %v1045_v35  ;;  %v1036_v51 = vadd.f32 1e-12, %v1020_v31  ;;  %v2288_v31 = vpack.c.bf16 %v1293_v36, %v1292_v34  ;;  %v1083_v39 = vsub.s32 2, %v2585_v60 }
 0x69d   :  { %v1033_v38 = vadd.f32 1e-12, %v1017_v41  ;;  %v1003_v58 = vmul.f32 %v955_v55, %v955_v55  ;;  %v1060_v61 = vmul.f32 %v2911_v19, %v1048_v1  ;;  %v1027_v9 = vsub.f32 %v2869_v13, %v955_v55  ;;  %v1286_v13 = vld [vmem:[%s3204_s1 + $0x60] sm:$0xff] }
 0x69e   :  { %v985_v48 = vpop.xlane.xlu0 %984  ;;  %v2922_v53 = vadd.f32 %v1068_v42, %v1057_v47  ;;  %v2276_v20 = vpack.c.bf16 %v1287_v21, %v1286_v13  ;;  %v1084_v35 = vrot.slane %v2908_v16, %v1083_v39 }
 0x69f   :  { %2407 = vrsqrt.f32 %v1033_v38  ;;  %v995_v56 = vmul.f32 0.03125, %v985_v48  ;;  %v2938_v4 = vadd.f32 %v1068_v42, %v1060_v61 }
 0x6a0   :  { %2156 = vmatprep.mubr.msk.f32.mxu1 %vm24_vm0, %v2922_v53  ;;  %2409 = vrsqrt.f32 %v1036_v51  ;;  %2277 = vmatprep.subr.bf16.mxu0 %v2276_v20 }
 0x6a1   :  { %v2404_v44 = vpop.eup %2403  ;;  %v1011_v29 = vsub.f32 %v995_v56, %v1003_v58  ;;  %2157 = vmatmul.mubr.msk.f32.vlgmr.msra.gmra.mrb[8].mxu1 %vm24_vm0, %v2924_v57  ;;  %2279 = vmatpush3.bf16.msra.mxu0 %v2276_v20 }
 0x6a2   :  { %v1047_v24 = vmul.f32 %v2404_v44, %v1023_v59  ;;  %v2406_v17 = vpop.eup %2405 }
 0x6a3   :  { %v1019_v52 = vmax.f32 %v1011_v29, 0.0  ;;  %v1050_v7 = vmul.f32 %v2406_v17, %v1026_v2 }
 0x6a4   :  { %v1059_v8 = vmul.f32 %v2911_v19, %v1047_v24 }
 0x6a5   :  { %v1035_v43 = vadd.f32 1e-12, %v1019_v52  ;;  %v1062_v15 = vmul.f32 %v2911_v19, %v1050_v7 }
 0x6a6   :  { %v2936_v50 = vadd.f32 %v1068_v42, %v1059_v8 }
 0x6a7   :  { %2411 = vrsqrt.f32 %v1035_v43  ;;  %v2951_v0 = vadd.f32 %v1068_v42, %v1062_v15 }
 0x6a8   :  { %2159 = vmatprep.mubr.msk.f32.mxu1 %vm24_vm0, %v2936_v50 }
 0x6a9   :  { %v2408_v5 = vpop.eup %2407  ;;  %2160 = vmatmul.mubr.msk.f32.gmra.mrb[10].mxu1 %vm24_vm0, %v2938_v4 }
 0x6aa   :  { %v1049_v10 = vmul.f32 %v2408_v5, %v1025_v54  ;;  %v2410_v49 = vpop.eup %2409 }
 0x6ab   :  { %v1052_v3 = vmul.f32 %v2410_v49, %v1028_v14 }
 0x6ac   :  { %v1061_v45 = vmul.f32 %v2911_v19, %v1049_v10 }
 0x6ad   :  { %v1064_v11 = vmul.f32 %v2911_v19, %v1052_v3 }
 0x6ae   :  { %v2949_v62 = vadd.f32 %v1068_v42, %v1061_v45 }
 0x6af   :  { %v2962_v33 = vadd.f32 %v1068_v42, %v1064_v11 }
 0x6b0   :  { %2162 = vmatprep.mubr.msk.f32.mxu1 %vm24_vm0, %v2949_v62 }
 0x6b1   :  { %v2412_v6 = vpop.eup %2411  ;;  %2163 = vmatmul.mubr.msk.f32.gmra.mrb[12].mxu1 %vm24_vm0, %v2951_v0 }
 0x6b2   :  { %v1051_v22 = vmul.f32 %v2412_v6, %v1027_v9 }
 0x6b4   :  { %v1063_v26 = vmul.f32 %v2911_v19, %v1051_v22  ;;  %v1288_v19 = vld [vmem:[%s3204_s1 + $0x70] sm:$0xff] }
 0x6b5   :  { %v2280_v37 = vpack.c.bf16 %v1289_v28, %v1288_v19 }
 0x6b6   :  { %v2960_v63 = vadd.f32 %v1068_v42, %v1063_v26 }
 0x6b7   :  { %2281 = vmatprep.subr.bf16.mxu0 %v2280_v37 }
 0x6b8   :  { %2165 = vmatprep.mubr.msk.f32.mxu1 %vm24_vm0, %v2960_v63  ;;  %2283 = vmatpush3.bf16.msra.mxu0 %v2280_v37 }
 0x6b9   :  { %2166 = vmatmul.mubr.msk.f32.gmra.mrb[14].mxu1 %vm24_vm0, %v2962_v33  ;;  %2285 = vmatprep.subr.bf16.mxu0 %v2284_v23 }
 0x6bc   :  { %2287 = vmatpush3.bf16.msra.mxu0 %v2284_v23 }
 0x6bd   :  { %2289 = vmatprep.subr.bf16.mxu0 %v2288_v31 }
 0x6c0   :  { %2291 = vmatpush3.bf16.msra.mxu0 %v2288_v31 }
 0x774   :  { %v2158_v40 = vpop.f32.mrb[8].mxu1 }
 0x775   :  { %v1181_v12 = vadd.f32 %v2158_v40, %v1084_v35  ;;  %v1175_v41 = vpop.f32.mrb[9].mxu1 }
 0x776   :  { %v1176_v55 = vadd.f32 %v1175_v41, %v1084_v35 }
 0x777   :  { %v1215_v42 = vmul.f32 %v1181_v12, %v1181_v12 }
 0x778   :  { %v1214_v46 = vmul.f32 %v1176_v55, %v1176_v55 }
 0x779   :  { %v1223_v47 = vmul.f32 %v1215_v42, %v1181_v12 }
 0x77a   :  { %v1222_v38 = vmul.f32 %v1214_v46, %v1176_v55 }
 0x77b   :  { %v1231_v51 = vmul.f32 0.044715, %v1223_v47 }
 0x77c   :  { %v1230_v48 = vmul.f32 0.044715, %v1222_v38  ;;  %v2161_v1 = vpop.f32.mrb[10].mxu1 }
 0x77d   :  { %v1239_v58 = vadd.f32 %v1231_v51, %v1181_v12  ;;  %v2996_v56 = vadd.f32 %v2161_v1, %v1084_v35  ;;  %v1185_v59 = vpop.f32.mrb[11].mxu1 }
 0x77e   :  { %v1238_v44 = vadd.f32 %v1230_v48, %v1176_v55  ;;  %v2998_v29 = vadd.f32 %v1185_v59, %v1084_v35 }
 0x77f   :  { %v1247_v24 = vmul.f32 0.7978846, %v1239_v58  ;;  %v1217_v52 = vmul.f32 %v2996_v56, %v2996_v56 }
 0x780   :  { %v1246_v61 = vmul.f32 0.7978846, %v1238_v44  ;;  %v1216_v17 = vmul.f32 %v2998_v29, %v2998_v29 }
 0x781   :  { %2413 = vtanh.f32 %v1247_v24  ;;  %v1225_v8 = vmul.f32 %v1217_v52, %v2996_v56 }
 0x782   :  { %2415 = vtanh.f32 %v1246_v61  ;;  %v1224_v2 = vmul.f32 %v1216_v17, %v2998_v29 }
 0x783   :  { %v1233_v43 = vmul.f32 0.044715, %v1225_v8 }
 0x784   :  { %v1232_v7 = vmul.f32 0.044715, %v1224_v2  ;;  %v2164_v54 = vpop.f32.mrb[12].mxu1 }
 0x785   :  { %v1241_v5 = vadd.f32 %v1233_v43, %v2996_v56  ;;  %v3007_v10 = vadd.f32 %v2164_v54, %v1084_v35  ;;  %v1195_v15 = vpop.f32.mrb[13].mxu1 }
 0x786   :  { %v1240_v49 = vadd.f32 %v1232_v7, %v2998_v29  ;;  %v1196_v45 = vadd.f32 %v1195_v15, %v1084_v35 }
 0x787   :  { %v1249_v14 = vmul.f32 0.7978846, %v1241_v5  ;;  %v1219_v3 = vmul.f32 %v3007_v10, %v3007_v10 }
 0x788   :  { %v1248_v9 = vmul.f32 0.7978846, %v1240_v49  ;;  %v1218_v6 = vmul.f32 %v1196_v45, %v1196_v45 }
 0x789   :  { %2417 = vtanh.f32 %v1249_v14  ;;  %v1227_v22 = vmul.f32 %v1219_v3, %v3007_v10 }
 0x78a   :  { %2419 = vtanh.f32 %v1248_v9  ;;  %v1226_v11 = vmul.f32 %v1218_v6, %v1196_v45 }
 0x78b   :  { %v2414_v26 = vpop.eup %2413  ;;  %v1235_v13 = vmul.f32 0.044715, %v1227_v22 }
 0x78c   :  { %v2416_v21 = vpop.eup %2415  ;;  %v1263_v20 = vadd.f32 1.0, %v2414_v26  ;;  %v1234_v19 = vmul.f32 0.044715, %v1226_v11  ;;  %v2167_v28 = vpop.f32.mrb[14].mxu1 }
 0x78d   :  { %v1243_v37 = vadd.f32 %v1235_v13, %v3007_v10  ;;  %v1211_v27 = vadd.f32 %v2167_v28, %v1084_v35  ;;  %v1205_v32 = vpop.f32.mrb[15].mxu1  ;;  %v1262_v23 = vadd.f32 1.0, %v2416_v21 }
 0x78e   :  { %v1271_v34 = vmul.f32 0.5, %v1263_v20  ;;  %v1242_v36 = vadd.f32 %v1234_v19, %v1196_v45  ;;  %v1206_v31 = vadd.f32 %v1205_v32, %v1084_v35 }
 0x78f   :  { %v1251_v40 = vmul.f32 0.7978846, %v1243_v37  ;;  %v1221_v41 = vmul.f32 %v1211_v27, %v1211_v27  ;;  %v1270_v42 = vmul.f32 0.5, %v1262_v23 }
 0x790   :  { %v1250_v46 = vmul.f32 0.7978846, %v1242_v36  ;;  %v1220_v47 = vmul.f32 %v1206_v31, %v1206_v31  ;;  %v1279_v48 = vmul.f32 %v1271_v34, %v1181_v12 }
 0x791   :  { %2421 = vtanh.f32 %v1251_v40  ;;  %v1229_v38 = vmul.f32 %v1221_v41, %v1211_v27  ;;  %v1278_v51 = vmul.f32 %v1270_v42, %v1176_v55 }
 0x792   :  { %2423 = vtanh.f32 %v1250_v46  ;;  %v1228_v1 = vmul.f32 %v1220_v47, %v1206_v31 }
 0x793   :  { %v2418_v58 = vpop.eup %2417  ;;  %v1237_v59 = vmul.f32 0.044715, %v1229_v38  ;;  %2184 = vmatprep.mubr.msk.f32.mxu0 %vm538_vm3, %v1278_v51 }
 0x794   :  { %v2420_v44 = vpop.eup %2419  ;;  %v1236_v24 = vmul.f32 0.044715, %v1228_v1  ;;  %2185 = vmatmul.mubr.msk.f32.vlgmr.msra.gmra.mrb[24].mxu0 %vm538_vm3, %v1279_v48  ;;  %v1265_v35 = vadd.f32 1.0, %v2418_v58 }
 0x795   :  { %v1245_v52 = vadd.f32 %v1237_v59, %v1211_v27  ;;  %v1264_v61 = vadd.f32 1.0, %v2420_v44 }
 0x796   :  { %v1244_v17 = vadd.f32 %v1236_v24, %v1206_v31  ;;  %v1273_v8 = vmul.f32 0.5, %v1265_v35 }
 0x797   :  { %v1253_v2 = vmul.f32 0.7978846, %v1245_v52  ;;  %v1272_v43 = vmul.f32 0.5, %v1264_v61 }
 0x798   :  { %v1252_v7 = vmul.f32 0.7978846, %v1244_v17  ;;  %v1281_v55 = vmul.f32 %v1273_v8, %v2996_v56 }
 0x799   :  { %2425 = vtanh.f32 %v1253_v2  ;;  %v1280_v12 = vmul.f32 %v1272_v43, %v2998_v29 }
 0x79a   :  { %2427 = vtanh.f32 %v1252_v7 }
 0x79b   :  { %v2422_v54 = vpop.eup %2421  ;;  %2187 = vmatprep.mubr.msk.f32.mxu0 %vm538_vm3, %v1280_v12 }
 0x79c   :  { %v2424_v5 = vpop.eup %2423  ;;  %2188 = vmatmul.mubr.msk.f32.gmra.mrb[26].mxu0 %vm538_vm3, %v1281_v55  ;;  %v1267_v15 = vadd.f32 1.0, %v2422_v54 }
 0x79d   :  { %v1266_v49 = vadd.f32 1.0, %v2424_v5 }
 0x79e   :  { %v1275_v14 = vmul.f32 0.5, %v1267_v15 }
 0x79f   :  { %v1274_v3 = vmul.f32 0.5, %v1266_v49 }
 0x7a0   :  { %v1283_v6 = vmul.f32 %v1275_v14, %v3007_v10 }
 0x7a1   :  { %v1282_v9 = vmul.f32 %v1274_v3, %v1196_v45  ;;  %v1296_v45 = vsub.s32 3, %v2585_v60 }
 0x7a3   :  { %v2426_v22 = vpop.eup %2425  ;;  %2190 = vmatprep.mubr.msk.f32.mxu0 %vm538_vm3, %v1282_v9  ;;  %v1297_v10 = vrot.slane %v2908_v16, %v1296_v45 }
 0x7a4   :  { %v2428_v29 = vpop.eup %2427  ;;  %2191 = vmatmul.mubr.msk.f32.gmra.mrb[28].mxu0 %vm538_vm3, %v1283_v6  ;;  %v1269_v56 = vadd.f32 1.0, %v2426_v22  ;;  %v1587_v6 = vld [vmem:[%s3204_s1 + $0xa0] sm:$0xff]  ;;  %v1588_v22 = vld [vmem:[%s3204_s1 + $0xa8] sm:$0xff] }
 0x7a5   :  { %v1268_v11 = vadd.f32 1.0, %v2428_v29  ;;  %v2293_v29 = vpack.c.bf16 %v1588_v22, %v1587_v6 }
 0x7a6   :  { %v1277_v26 = vmul.f32 0.5, %v1269_v56  ;;  %v2458_v56 = vmov 0.0|0.0  }
 0x7a7   :  { %v1276_v13 = vmul.f32 0.5, %v1268_v11  ;;  %2292 = vmatprep.subr.bf16.mxu1 %v2458_v56  ;;  %v1589_v11 = vld [vmem:[%s3204_s1 + $0xb0] sm:$0xff] }
 0x7a8   :  { %v1285_v20 = vmul.f32 %v1277_v26, %v1211_v27  ;;  %v1590_v26 = vld [vmem:[%s3204_s1 + $0xb8] sm:$0xff]  ;;  %2294 = vmatpush3.bf16.msra.mxu1 %v2293_v29 }
 0x7a9   :  { %v1284_v21 = vmul.f32 %v1276_v13, %v1206_v31  ;;  %v2296_v13 = vpack.c.bf16 %v1590_v26, %v1589_v11  ;;  %2295 = vmatprep.subr.bf16.mxu1 %v2458_v56 }
 0x7ab   :  { %2193 = vmatprep.mubr.msk.f32.mxu0 %vm538_vm3, %v1284_v21  ;;  %v2460_v21 = vmov 0.0  }
 0x7ac   :  { %2194 = vmatmul.mubr.msk.f32.gmra.mrb[30].mxu0 %vm538_vm3, %v1285_v20  ;;  %2204 = vmatprep.mubr.msk.f32.mxu1 %vm2459_vm11, %v2460_v21  ;;  %vm1622_vm3 = vcmask 1047559  }
 0x7ad   :  { %2297 = vmatpush3.bf16.msra.mxu1 %v2296_v13 }
 0x7ae   :  { %2207 = vmatprep.subr.mxu1 %v2460_v21 }
 0x867   :  { %v2186_v19 = vpop.f32.mrb[24].mxu0 }
 0x868   :  { %v1394_v28 = vadd.f32 %v2186_v19, %v1297_v10  ;;  %v1388_v37 = vpop.f32.mrb[25].mxu0 }
 0x869   :  { %v1389_v32 = vadd.f32 %v1388_v37, %v1297_v10 }
 0x86a   :  { %v3028_v23 = vadd.f32 %v1394_v28, %v2924_v57 }
 0x86b   :  { %v3031_v34 = vadd.f32 %v1389_v32, %v2922_v53 }
 0x86c   :  { %v1438_v27 = vsel %vm24_vm0, %v3028_v23, 0.0  ;;  %v1468_v41 = vmul.f32 %v3028_v23, %v3028_v23 }
 0x86d   :  { %1439 = vadd.xlane.f32.xlu0 %v1438_v27  ;;  %v1435_v16 = vsel %vm24_vm0, %v3031_v34, 0.0  ;;  %v1467_v53 = vmul.f32 %v3031_v34, %v3031_v34 }
 0x86e   :  { %v1478_v47 = vsel %vm24_vm0, %v1468_v41, 0.0 }
 0x86f   :  { %v2189_v36 = vpop.f32.mrb[26].mxu0  ;;  %v1475_v48 = vsel %vm24_vm0, %v1467_v53, 0.0 }
 0x870   :  { %v1404_v31 = vadd.f32 %v2189_v36, %v1297_v10  ;;  %v1398_v40 = vpop.f32.mrb[27].mxu0 }
 0x871   :  { %v1399_v42 = vadd.f32 %v1398_v40, %v1297_v10  ;;  %1436 = vadd.xlane.f32.xlu0 %v1435_v16 }
 0x872   :  { %v3040_v57 = vadd.f32 %v1404_v31, %v2938_v4 }
 0x873   :  { %v3045_v46 = vadd.f32 %v1399_v42, %v2936_v50 }
 0x874   :  { %v1444_v38 = vsel %vm24_vm0, %v3040_v57, 0.0  ;;  %v1470_v50 = vmul.f32 %v3040_v57, %v3040_v57 }
 0x875   :  { %1479 = vadd.xlane.f32.xlu0 %v1478_v47  ;;  %1445 = vadd.xlane.f32.xlu1 %v1444_v38  ;;  %v1441_v4 = vsel %vm24_vm0, %v3045_v46, 0.0  ;;  %v1469_v59 = vmul.f32 %v3045_v46, %v3045_v46 }
 0x876   :  { %v1484_v52 = vsel %vm24_vm0, %v1470_v50, 0.0 }
 0x877   :  { %v2192_v51 = vpop.f32.mrb[28].mxu0  ;;  %v1481_v35 = vsel %vm24_vm0, %v1469_v59, 0.0 }
 0x878   :  { %v1414_v1 = vadd.f32 %v2192_v51, %v1297_v10  ;;  %v1408_v58 = vpop.f32.mrb[29].mxu0 }
 0x879   :  { %1476 = vadd.xlane.f32.xlu0 %v1475_v48  ;;  %1442 = vadd.xlane.f32.xlu1 %v1441_v4  ;;  %v1409_v24 = vadd.f32 %v1408_v58, %v1297_v10 }
 0x87a   :  { %v3058_v44 = vadd.f32 %v1414_v1, %v2951_v0 }
 0x87b   :  { %v3063_v17 = vadd.f32 %v1409_v24, %v2949_v62 }
 0x87c   :  { %v1450_v43 = vsel %vm24_vm0, %v3058_v44, 0.0  ;;  %v1472_v54 = vmul.f32 %v3058_v44, %v3058_v44 }
 0x87d   :  { %1482 = vadd.xlane.f32.xlu0 %v1481_v35  ;;  %1485 = vadd.xlane.f32.xlu1 %v1484_v52  ;;  %v1447_v55 = vsel %vm24_vm0, %v3063_v17, 0.0 }
 0x87e   :  { %v1490_v5 = vsel %vm24_vm0, %v1472_v54, 0.0 }
 0x87f   :  { %v2195_v61 = vpop.f32.mrb[30].mxu0 }
 0x880   :  { %v1424_v8 = vadd.f32 %v2195_v61, %v1297_v10  ;;  %v1418_v2 = vpop.f32.mrb[31].mxu0 }
 0x881   :  { %v1419_v7 = vadd.f32 %v1418_v2, %v1297_v10  ;;  %1451 = vadd.xlane.f32.xlu1 %v1450_v43 }
 0x882   :  { %v3068_v0 = vadd.f32 %v1424_v8, %v2962_v33 }
 0x883   :  { %v3071_v12 = vadd.f32 %v1419_v7, %v2960_v63  ;;  %v1471_v63 = vmul.f32 %v3063_v17, %v3063_v17 }
 0x884   :  { %v1456_v62 = vsel %vm24_vm0, %v3068_v0, 0.0  ;;  %v1474_v3 = vmul.f32 %v3068_v0, %v3068_v0 }
 0x885   :  { %1448 = vadd.xlane.f32.xlu1 %v1447_v55  ;;  %1457 = vadd.xlane.f32.xlu0 %v1456_v62  ;;  %v1453_v33 = vsel %vm24_vm0, %v3071_v12, 0.0  ;;  %v1473_v15 = vmul.f32 %v3071_v12, %v3071_v12  ;;  %v1487_v49 = vsel %vm24_vm0, %v1471_v63, 0.0 }
 0x886   :  { %v1496_v9 = vsel %vm24_vm0, %v1474_v3, 0.0 }
 0x887   :  { %v1493_v14 = vsel %vm24_vm0, %v1473_v15, 0.0 }
 0x889   :  { %1491 = vadd.xlane.f32.xlu1 %v1490_v5  ;;  %1454 = vadd.xlane.f32.xlu0 %v1453_v33 }
 0x88d   :  { %1488 = vadd.xlane.f32.xlu1 %v1487_v49  ;;  %1494 = vadd.xlane.f32.xlu0 %v1493_v14 }
 0x891   :  { %1497 = vadd.xlane.f32.xlu1 %v1496_v9 }
 0x8fa   :  { %v1440_v20 = vpop.xlane.xlu0 %1439 }
 0x8fb   :  { %v3106_v28 = vmul.f32 0.03125, %v1440_v20 }
 0x8fd   :  { %v1508_v41 = vmul.f32 %v3106_v28, %v3106_v28 }
 0x8fe   :  { %v1437_v45 = vpop.xlane.xlu0 %1436 }
 0x8ff   :  { %v3108_v37 = vmul.f32 0.03125, %v1437_v45 }
 0x901   :  { %v1507_v42 = vmul.f32 %v3108_v37, %v3108_v37 }
 0x902   :  { %v1446_v10 = vpop.xlane.xlu1 %1445  ;;  %v1480_v19 = vpop.xlane.xlu0 %1479 }
 0x903   :  { %v3110_v32 = vmul.f32 0.03125, %v1446_v10  ;;  %v1500_v27 = vmul.f32 0.03125, %v1480_v19 }
 0x905   :  { %v1510_v53 = vmul.f32 %v3110_v32, %v3110_v32  ;;  %v1516_v47 = vsub.f32 %v1500_v27, %v1508_v41 }
 0x906   :  { %v1443_v36 = vpop.xlane.xlu1 %1442  ;;  %v1477_v31 = vpop.xlane.xlu0 %1476 }
 0x907   :  { %v3112_v40 = vmul.f32 0.03125, %v1443_v36  ;;  %v1499_v16 = vmul.f32 0.03125, %v1477_v31  ;;  %v1524_v24 = vmax.f32 %v1516_v47, 0.0  ;;  %v3135_v31 = vld [vmem:[%s3204_s1 + $0xc8] sm:$0xff] }
 0x909   :  { %v1509_v48 = vmul.f32 %v3112_v40, %v3112_v40  ;;  %v1515_v1 = vsub.f32 %v1499_v16, %v1507_v42  ;;  %v1540_v43 = vadd.f32 1e-12, %v1524_v24 }
 0x90a   :  { %v1486_v38 = vpop.xlane.xlu1 %1485  ;;  %v1483_v51 = vpop.xlane.xlu0 %1482 }
 0x90b   :  { %v1502_v58 = vmul.f32 0.03125, %v1486_v38  ;;  %v1501_v4 = vmul.f32 0.03125, %v1483_v51  ;;  %v1523_v52 = vmax.f32 %v1515_v1, 0.0 }
 0x90d   :  { %v1518_v59 = vsub.f32 %v1502_v58, %v1510_v53  ;;  %v1517_v50 = vsub.f32 %v1501_v4, %v1509_v48  ;;  %v1539_v62 = vadd.f32 1e-12, %v1523_v52  ;;  %v1533_v53 = vsub.f32 %v3045_v46, %v3112_v40 }
 0x90e   :  { %v1452_v35 = vpop.xlane.xlu1 %1451  ;;  %v1532_v48 = vsub.f32 %v3028_v23, %v3106_v28  ;;  %v1534_v46 = vsub.f32 %v3040_v57, %v3110_v32 }
 0x90f   :  { %v1525_v61 = vmax.f32 %v1517_v50, 0.0  ;;  %v1526_v8 = vmax.f32 %v1518_v59, 0.0  ;;  %v1464_v54 = vmul.f32 0.03125, %v1452_v35  ;;  %v1566_v59 = vrot.slane %v3135_v31, %v2671_v25 }
 0x910   :  { %v1531_v35 = vsub.f32 %v3031_v34, %v3108_v37 }
 0x911   :  { %v1541_v2 = vadd.f32 1e-12, %v1525_v61  ;;  %v1542_v5 = vadd.f32 1e-12, %v1526_v8  ;;  %v1512_v49 = vmul.f32 %v1464_v54, %v1464_v54 }
 0x912   :  { %v1449_v7 = vpop.xlane.xlu1 %1448  ;;  %v1458_v55 = vpop.xlane.xlu0 %1457 }
 0x913   :  { %2429 = vrsqrt.f32 %v1541_v2  ;;  %v3122_v33 = vmul.f32 0.03125, %v1449_v7  ;;  %v3130_v20 = vmul.f32 0.03125, %v1458_v55  ;;  %v1578_v2 = vrot.slane %v3135_v31, %v786_v30 }
 0x914   :  { %2431 = vrsqrt.f32 %v1540_v43  ;;  %v1536_v7 = vsub.f32 %v3058_v44, %v1464_v54 }
 0x915   :  { %2433 = vrsqrt.f32 %v1539_v62  ;;  %v1511_v6 = vmul.f32 %v3122_v33, %v3122_v33  ;;  %v1514_v47 = vmul.f32 %v3130_v20, %v3130_v20 }
 0x916   :  { %v1492_v63 = vpop.xlane.xlu1 %1491  ;;  %v1455_v15 = vpop.xlane.xlu0 %1454  ;;  %2435 = vrsqrt.f32 %v1542_v5  ;;  %v1535_v5 = vsub.f32 %v3063_v17, %v3122_v33 }
 0x917   :  { %v1504_v14 = vmul.f32 0.03125, %v1492_v63  ;;  %v3124_v3 = vmul.f32 0.03125, %v1455_v15 }
 0x919   :  { %v1520_v9 = vsub.f32 %v1504_v14, %v1512_v49  ;;  %v1513_v11 = vmul.f32 %v3124_v3, %v3124_v3  ;;  %v1537_v30 = vsub.f32 %v3071_v12, %v3124_v3 }
 0x91a   :  { %v1489_v22 = vpop.xlane.xlu1 %1488  ;;  %v1495_v29 = vpop.xlane.xlu0 %1494 }
 0x91b   :  { %v1528_v56 = vmax.f32 %v1520_v9, 0.0  ;;  %v1503_v26 = vmul.f32 0.03125, %v1489_v22  ;;  %v1505_v13 = vmul.f32 0.03125, %v1495_v29  ;;  %v1538_v29 = vsub.f32 %v3068_v0, %v3130_v20 }
 0x91d   :  { %v1544_v45 = vadd.f32 1e-12, %v1528_v56  ;;  %v1519_v10 = vsub.f32 %v1503_v26, %v1511_v6  ;;  %v1521_v19 = vsub.f32 %v1505_v13, %v1513_v11  ;;  %v2430_v36 = vpop.eup %2429 }
 0x91e   :  { %v1498_v27 = vpop.xlane.xlu1 %1497  ;;  %v2432_v42 = vpop.eup %2431  ;;  %v1557_v50 = vmul.f32 %v2430_v36, %v1533_v53 }
 0x91f   :  { %2437 = vrsqrt.f32 %v1544_v45  ;;  %v1527_v16 = vmax.f32 %v1519_v10, 0.0  ;;  %v1529_v41 = vmax.f32 %v1521_v19, 0.0  ;;  %v1506_v38 = vmul.f32 0.03125, %v1498_v27  ;;  %v2434_v51 = vpop.eup %2433 }
 0x920   :  { %v2436_v4 = vpop.eup %2435  ;;  %v1556_v40 = vmul.f32 %v2432_v42, %v1532_v48  ;;  %v1555_v61 = vmul.f32 %v2434_v51, %v1531_v35  ;;  %v1569_v28 = vmul.f32 %v1566_v59, %v1557_v50  ;;  %v2461_v51 = vmov 0   ;;  %v1779_v35 = vld [vmem:[%s3205_s2] sm:$0x1]  ;;  %s2463_s2 = smov 4  }
 0x921   :  { %v1543_v1 = vadd.f32 1e-12, %v1527_v16  ;;  %v1545_v58 = vadd.f32 1e-12, %v1529_v41  ;;  %v1522_v24 = vsub.f32 %v1506_v38, %v1514_v47  ;;  %v1558_v23 = vmul.f32 %v2436_v4, %v1534_v46  ;;  %2348 = vset.pattern.permute.xlu0 %v2461_v51 }
 0x922   :  { %v1568_v43 = vmul.f32 %v1566_v59, %v1556_v40  ;;  %v1567_v37 = vmul.f32 %v1566_v59, %v1555_v61  ;;  %v1581_v57 = vadd.f32 %v1578_v2, %v1569_v28  ;;  %1699 = vperm.xlu0 %2348, %v3135_v31   ;;  %v1594_v48 = vrot.slane %v3135_v31, %v1083_v39 }
 0x923   :  { %2439 = vrsqrt.f32 %v1543_v1  ;;  %v1530_v52 = vmax.f32 %v1522_v24, 0.0  ;;  %v1570_v55 = vmul.f32 %v1566_v59, %v1558_v23  ;;  %v1701_v50 = vrot.slane %v3135_v31, 3 }
 0x924   :  { %2441 = vrsqrt.f32 %v1545_v58  ;;  %v1580_v62 = vadd.f32 %v1578_v2, %v1568_v43  ;;  %v1579_v15 = vadd.f32 %v1578_v2, %v1567_v37  ;;  %v1606_v6 = vrot.slane %v1581_v57, 6 }
 0x925   :  { %v1546_v8 = vadd.f32 1e-12, %v1530_v52  ;;  %v1582_v49 = vadd.f32 %v1578_v2, %v1570_v55  ;;  %vm1780_vm4 = vcmp.eq.s32.totalorder %v1779_v35, 0  ;;  %v2462_v52 = vmov 1966171168  }
 0x926   :  { %v1603_v54 = vrot.slane %v1580_v62, 7  ;;  %v1821_v61 = vunpack.c.l.s4 %v2462_v52 }
 0x927   :  { %2443 = vrsqrt.f32 %v1546_v8  ;;  %v1609_v11 = vrot.slane %v1582_v49, 5 }
 0x928   :  { %v1605_v26 = vsel %vm1604_vm12, %v1603_v54, %v1579_v15  ;;  %v1822_v28 = vunpack.c.0.s8 %v1821_v61  ;;  %vm1889_vm12 = vcmask 80896  }
 0x929   :  { %v2438_v34 = vpop.eup %2437  ;;  %v1608_v10 = vsel %vm1607_vm13, %v1606_v6, %v1605_v26  ;;  %vm1891_vm13 = vcmask 89088  }
 0x92a   :  { %v1560_v32 = vmul.f32 %v2438_v34, %v1536_v7  ;;  %v1611_v36 = vsel %vm1610_vm14, %v1609_v11, %v1608_v10  ;;  %v1825_v8 = vsub.s32 %v1822_v28, %v2585_v60  ;;  %vm1893_vm14 = vcmask 97280  }
 0x92c   :  { %v1572_v14 = vmul.f32 %v1566_v59, %v1560_v32 }
 0x92d   :  { %v2440_v63 = vpop.eup %2439 }
 0x92e   :  { %v2442_v9 = vpop.eup %2441  ;;  %v1559_v44 = vmul.f32 %v2440_v63, %v1535_v5  ;;  %v1584_v33 = vadd.f32 %v1578_v2, %v1572_v14 }
 0x92f   :  { %v1561_v22 = vmul.f32 %v2442_v9, %v1537_v30 }
 0x930   :  { %v1571_v56 = vmul.f32 %v1566_v59, %v1559_v44  ;;  %v1615_v16 = vrot.slane %v1584_v33, 3 }
 0x931   :  { %v1573_v17 = vmul.f32 %v1566_v59, %v1561_v22  ;;  %v2444_v13 = vpop.eup %2443 }
 0x932   :  { %v1583_v45 = vadd.f32 %v1578_v2, %v1571_v56  ;;  %v1562_v12 = vmul.f32 %v2444_v13, %v1538_v29 }
 0x933   :  { %v1585_v3 = vadd.f32 %v1578_v2, %v1573_v17 }
 0x934   :  { %v1612_v19 = vrot.slane %v1583_v45, 4  ;;  %v1574_v27 = vmul.f32 %v1566_v59, %v1562_v12 }
 0x935   :  { %v1618_v0 = vrot.slane %v1585_v3, 2 }
 0x936   :  { %v1614_v41 = vsel %vm1613_vm15, %v1612_v19, %v1611_v36  ;;  %v1586_v20 = vadd.f32 %v1578_v2, %v1574_v27  ;;  %v1826_v2 = vrot.slane %v2719_v18, %v1825_v8  ;;  %vm1895_vm15 = vcmask 105472  }
 0x937   :  { %v1617_v42 = vsel %vm1616_vm1, %v1615_v16, %v1614_v41 }
 0x938   :  { %v1620_v53 = vsel %vm1619_vm2, %v1618_v0, %v1617_v42  ;;  %v1621_v47 = vrot.slane %v1586_v20, 1  ;;  %v1833_v43 = vrot.slane %v1826_v2, %v1825_v8 }
 0x93a   :  { %v1623_v38 = vsel %vm1622_vm3, %v1621_v47, %v1620_v53 }
 0x93b   :  { %2205 = vmatmul.mubr.msk.f32.vlgmr.msra.gmra.mrb[16].mxu1 %vm24_vm0, %v1623_v38 }
 0x93c   :  { %2209 = vmatprep.mubr.msk.f32.mxu1 %vm2459_vm11, %v2460_v21  ;;  %vm1887_vm11 = vcmask 72704  }
 0x9a1   :  { %v1700_v21 = vpop.permute.xlu0 %1699 }
 0x9a2   :  { %v1702_v24 = vrot.slane %v1700_v21, 4 }
 0xa0e   :  { %v1692_v1 = vpop.f32.mrb[16].mxu1 }
 0xa0f   :  { %v1693_v58 = vadd.f32 %v1692_v1, %v1594_v48  ;;  %v2206_v4 = vpop.f32.mrb[17].mxu1 }
 0xa11   :  { %2445 = vtanh.f32 %v1693_v58 }
 0xa1b   :  { %v2446_v59 = vpop.eup %2445 }
 0xa1c   :  { %2208 = vmatpush3.xpose.msk.msra.mxu1 %vm24_vm0, %v2446_v59 }
 0xa1f   :  { %2210 = vmatmul.mubr.msk.f32.vlgmr.msra.gmra.mrb[18].mxu1 %vm24_vm0, %v1701_v50  ;;  %vm1782_vm0 = vcmask 24576  }
 0xaf2   :  { %v1775_v46 = vpop.f32.mrb[18].mxu1 }
 0xaf3   :  { %v1776_v39 = vadd.f32 %v1775_v46, %v1702_v24  ;;  %v2211_v40 = vpop.f32.mrb[19].mxu1 }
 0xaf5   :  { %v3172_v23 = vsel %vm1780_vm4, -inf, %v1776_v39 }
 0xaf6   :  { %v1816_v31 = vsel %vm1815_vm5, %v3172_v23, -inf  ;;  %v1783_v7 = vsel %vm1782_vm0, %v3172_v23, -inf  ;;  %v1873_v17 = vrot.slane %v3172_v23, %v2671_v25 }
 0xaf7   :  { %1817 = vmax.xlane.f32.xlu1 %v1816_v31 }
 0xb08   :  { %1834 = vrot.lane.b32.xlu1 %v1833_v43, %s2463_s2 }
 0xb2c   :  { %1784 = vmax.xlane.f32.xlu1 %v1783_v7 }
 0xb84   :  { %v3180_v34 = vpop.xlane.xlu1 %1817 }
 0xb85   :  { %v1852_v37 = vsub.f32 %v3172_v23, %v3180_v34  ;;  %vm1819_vm6 = vcmp.eq.f32.partialorder %v3172_v23, %v3180_v34 }
 0xb87   :  { %v1853_v55 = vmul.f32 1.442695, %v1852_v37 }
 0xb88   :  { %v1835_v60 = vpop.permute.xlu1 %1834 }
 0xb89   :  { %2447 = vpow2.f32 %v1853_v55  ;;  %v1836_v57 = vsel %vm1819_vm6, %v1835_v60, 4 }
 0xb8a   :  { %v1837_v32 = vsel %vm1815_vm5, %v1836_v57, 2147483647 }
 0xb8b   :  { %v1839_v62 = vshra.s32 %v1837_v32, 16  ;;  %v1838_v33 = vand.u32 65535, %v1837_v32 }
 0xb8d   :  { %v1841_v5 = vcvt.s32.f32 %v1839_v62  ;;  %v1840_v12 = vcvt.s32.f32 %v1838_v33 }
 0xb8f   :  { %1842 = vmin.xlane.f32.xlu0 %v1841_v5 }
 0xb93   :  { %v2448_v63 = vpop.eup %2447 }
 0xb94   :  { %v1859_v15 = vrot.slane %v2448_v63, %v2671_v25 }
 0xb96   :  { %1860 = vrot.lane.b32.xlu1 %v1859_v15, %s2464_s28 }
 0xbb9   :  { %v1785_v49 = vpop.xlane.xlu1 %1784 }
 0xbba   :  { %v1803_v14 = vsub.f32 %v3172_v23, %v1785_v49  ;;  %vm1786_vm7 = vcmp.eq.f32.partialorder %v3172_v23, %v1785_v49  ;;  %v1886_v39 = vsel %vm1885_vm10, %v3172_v23, %v1785_v49 }
 0xbbb   :  { %v1787_v30 = vsel %vm1786_vm7, %v2719_v18, 4  ;;  %v1888_v61 = vsel %vm1887_vm11, %v1886_v39, %v3180_v34 }
 0xbbc   :  { %v1804_v9 = vmul.f32 1.442695, %v1803_v14  ;;  %v1788_v6 = vsel %vm1782_vm0, %v1787_v30, 2147483647 }
 0xbbd   :  { %v1790_v44 = vshra.s32 %v1788_v6, 16  ;;  %v1789_v18 = vand.u32 65535, %v1788_v6 }
 0xbbe   :  { %2449 = vpow2.f32 %v1804_v9 }
 0xbbf   :  { %v1792_v54 = vcvt.s32.f32 %v1790_v44  ;;  %v1791_v45 = vcvt.s32.f32 %v1789_v18 }
 0xbc1   :  { %1793 = vmin.xlane.f32.xlu1 %v1792_v54 }
 0xbc8   :  { %v2450_v22 = vpop.eup %2449 }
 0xbc9   :  { %v1806_v29 = vsel %vm1782_vm0, %v2450_v22, 0.0 }
 0xbca   :  { %1807 = vadd.xlane.f32.xlu1 %v1806_v29 }
 0xc08   :  { %v1861_v56 = vpop.permute.xlu1 %1860 }
 0xc09   :  { %v1863_v11 = vsel %vm1782_vm0, %v1861_v56, 0.0 }
 0xc0a   :  { %1864 = vadd.xlane.f32.xlu1 %v1863_v11 }
 0xc1b   :  { %1874 = vrot.lane.b32.xlu1 %v1873_v17, %s2464_s28 }
 0xc1c   :  { %v1843_v26 = vpop.xlane.xlu0 %1842 }
 0xc1d   :  { %vm1844_vm9 = vcmp.eq.f32.partialorder %v1841_v5, %v1843_v26  ;;  %v1849_v4 = vcvt.f32.s32 %v1843_v26 }
 0xc1e   :  { %v1845_v3 = vsel %vm1844_vm9, %v1840_v12, inf }
 0xc1f   :  { %v1850_v24 = vshll.u32 %v1849_v4, 16 }
 0xc4e   :  { %v1794_v13 = vpop.xlane.xlu1 %1793 }
 0xc4f   :  { %vm1795_vm8 = vcmp.eq.f32.partialorder %v1792_v54, %v1794_v13  ;;  %v1800_v1 = vcvt.f32.s32 %v1794_v13 }
 0xc50   :  { %v1796_v10 = vsel %vm1795_vm8, %v1791_v45, inf }
 0xc51   :  { %1797 = vmin.xlane.f32.xlu0 %v1796_v10  ;;  %v1801_v21 = vshll.u32 %v1800_v1, 16 }
 0xc55   :  { %1846 = vmin.xlane.f32.xlu0 %v1845_v3 }
 0xc57   :  { %v1808_v19 = vpop.xlane.xlu1 %1807 }
 0xc58   :  { %2451 = vlog2.f32 %v1808_v19 }
 0xc62   :  { %v2452_v36 = vpop.eup %2451 }
 0xc63   :  { %v1810_v16 = vmul.f32 0.6931472, %v2452_v36 }
 0xc65   :  { %v1811_v41 = vadd.f32 %v1810_v16, %v1785_v49 }
 0xc67   :  { %v1812_v53 = vsub.f32 %v1811_v41, %v3172_v23 }
 0xc97   :  { %v1865_v27 = vpop.xlane.xlu1 %1864 }
 0xc98   :  { %2453 = vlog2.f32 %v1865_v27 }
 0xc9b   :  { %v1875_v42 = vpop.permute.xlu1 %1874 }
 0xca2   :  { %v2454_v25 = vpop.eup %2453 }
 0xca3   :  { %v1867_v0 = vmul.f32 0.6931472, %v2454_v25 }
 0xca5   :  { %v1868_v20 = vadd.f32 %v1867_v0, %v3180_v34 }
 0xca7   :  { %v1877_v47 = vsub.f32 %v1868_v20, %v1875_v42 }
 0xca9   :  { %v1878_v38 = vadd.f32 %v1877_v47, %v1812_v53 }
 0xcab   :  { %v1880_v51 = vmul.f32 0.5, %v1878_v38 }
 0xcad   :  { %1882 = vrot.lane.b32.xlu0 %v1880_v51, %s2465_s29 }
 0xcde   :  { %v1798_v48 = vpop.xlane.xlu0 %1797 }
 0xcdf   :  { %v1799_v59 = vcvt.f32.s32 %v1798_v48 }
 0xce1   :  { %v1802_v35 = vadd.s32 %v1801_v21, %v1799_v59 }
 0xce2   :  { %v1847_v58 = vpop.xlane.xlu0 %1846 }
 0xce3   :  { %v1848_v50 = vcvt.f32.s32 %v1847_v58  ;;  %v1814_v40 = vcvt.s32.f32 %v1802_v35 }
 0xce5   :  { %v1851_v46 = vadd.s32 %v1850_v24, %v1848_v50  ;;  %v1890_v31 = vsel %vm1889_vm12, %v1888_v61, %v1814_v40 }
 0xce7   :  { %v1879_v52 = vcvt.s32.f32 %v1851_v46 }
 0xce9   :  { %v1892_v28 = vsel %vm1891_vm13, %v1890_v31, %v1879_v52 }
 0xd1f   :  { %v1883_v8 = vpop.permute.xlu0 %1882 }
 0xd20   :  { %v1894_v2 = vsel %vm1893_vm14, %v1892_v28, %v1883_v8 }
 0xd21   :  { %v1896_v43 = vsel %vm1895_vm15, %v1894_v2, 0.0 }
 0xd22   :  { %1897 = vst [vmem:[%s3206_s3] sm:$0x1] %v1896_v43 }

</bundles_post_ra>
